<compile_context>
chip_gen: v5e
topology: v5e:2x2
jax: 0.10.0
libtpu: 0.0.40
codegen_flags: <defaults>
</compile_context>

<pallas_src>
import math

import jax
import jax.numpy as jnp
from jax import lax
from jax.experimental import pallas as pl
from jax.experimental.pallas import tpu as pltpu

EPS = 1e-5
CP = 128          # padded OUTPUT channel count (lane-dense matmul result/store)
ROW_CHUNK = 8     # depthwise accumulator tile: 8 output rows at a time


def _make_kernel(n, ho, wo, c):
    hw = ho * wo
    m = n * hw
    inv_m = 1.0 / m
    row_gcd = math.gcd(ho, ROW_CHUNK)

    def kernel(ph_ref, w_dw_ref, g1_ref, w_pw_ref, g2_ref, b2_ref,
               o_ref, y_ref, s1_ref, ss1_ref):
        # ph_ref : (1, 4, ho+1, wo+1, c)  polyphase block for image i (88 ch)
        # w_dw_ref: (3, 3, c)             depthwise 3x3 weights
        # g1_ref : (1, c)                 BN1 gamma.  (BN1 beta / mean shift are
        #                                 per-channel constants through the 1x1
        #                                 conv and are absorbed by BN2 -> not
        #                                 needed in the kernel at all.)
        # w_pw_ref: (CP, c)               1x1 conv weight (Cout padded to 128, Cin)
        # g2_ref/b2_ref: (1, CP)          BN2 affine, zero-padded lanes
        # o_ref  : (m, CP)                final output (VMEM-resident across grid)
        # y_ref  : (n*ho, wo, c)          scratch: raw depthwise-conv output
        # s1_ref/ss1_ref: (1, c)          running per-channel sum / sum-of-squares
        i = pl.program_id(0)

        @pl.when(i == 0)
        def _init():
            s1_ref[...] = jnp.zeros_like(s1_ref)
            ss1_ref[...] = jnp.zeros_like(ss1_ref)

        # Hoist the 9 depthwise weight vectors out of every loop (JAX does not
        # CSE repeated loads / broadcasts).
        wv = [[w_dw_ref[ky, kx].reshape(1, 1, c) for kx in range(3)]
              for ky in range(3)]

        # ---- Stage 1: fused ReLU + depthwise 3x3 stride-2 conv, row-chunked --
        for r0 in range(0, ho, ROW_CHUNK):
            rows = min(ROW_CHUNK, ho - r0)
            acc = jnp.zeros((rows, wo, c), jnp.float32)
            for a in range(2):
                for b in range(2):
                    p = 2 * a + b
                    # ReLU hoisted: once per (phase, chunk), not once per tap.
                    xr = jnp.maximum(ph_ref[0, p, r0:r0 + rows + 1], 0.0)
                    # Pre-shift once per phase so taps are H-only (aligned)
                    # slices instead of per-tap W-misaligned windows.
                    xs = (xr[:, 0:wo, :], xr[:, 1:1 + wo, :])
                    for dy in range(2):
                        ky = 2 * dy + a
                        if ky > 2:
                            continue
                        for dx in range(2):
                            kx = 2 * dx + b
                            if kx > 2:
                                continue
                            acc = acc + xs[dx][dy:dy + rows] * wv[ky][kx]
            # Single-pass BN1 statistics while acc is live in vregs.
            s1_ref[...] += jnp.sum(acc, axis=(0, 1)).reshape(1, c)
            ss1_ref[...] += jnp.sum(acc * acc, axis=(0, 1)).reshape(1, c)
            start = i * ho + r0
            if row_gcd > 1:
                start = pl.multiple_of(start, row_gcd)
            y_ref[pl.ds(start, rows), :, :] = acc

        # ---- Stage 2 (last grid step): BN1 folded into 1x1 conv, then BN2 ----
        @pl.when(i == pl.num_programs(0) - 1)
        def _finalize():
            mean1 = s1_ref[...] * inv_m                               # (1, c)
            var1 = ss1_ref[...] * inv_m - mean1 * mean1               # biased
            scale1 = g1_ref[...] * lax.rsqrt(var1 + EPS)              # (1, c)
            # Fold BN1's scale into the 1x1 weights (per-input-channel columns
            # of the (Cout, Cin) weight).  BN1's additive term is dropped: it
            # is a per-output-channel constant after the 1x1 conv and cancels
            # in BN2's centering.
            w_fold = w_pw_ref[...] * scale1                           # (CP, c)
            y = y_ref[...].reshape(m, c)
            # z[m, o] = sum_k y[m, k] * w_fold[o, k]   (single MXU matmul)
            z = lax.dot_general(y, w_fold, (((1,), (1,)), ((), ())),
                                preferred_element_type=jnp.float32)   # (m, CP)
            mean2 = jnp.sum(z, axis=0, keepdims=True) * inv_m
            d2 = z - mean2
            var2 = jnp.sum(d2 * d2, axis=0, keepdims=True) * inv_m
            scale2 = g2_ref[...] * lax.rsqrt(var2 + EPS)
            o_ref[...] = d2 * scale2 + b2_ref[...]

    return kernel


def forward(x_nchw, params):
    w_dw = params["w_dw"]        # (3, 3, C)  depthwise weights (HWC layout)
    g1 = params["g1"]            # (C,)       BN1 gamma  (BN1 beta not needed)
    w_pw_oi = params["w_pw_oi"]  # (Cout, Cin) == conv2d5.weight[:, :, 0, 0]
    g2, b2 = params["g2"], params["b2"]

    n, c, h, w = x_nchw.shape
    assert h % 2 == 0 and w % 2 == 0, "polyphase split assumes even H and W"
    ho, wo = h // 2, w // 2
    hw = ho * wo
    m = n * hw
    hph, wph = ho + 1, wo + 1

    # Layout glue (XLA): NCHW -> NHWC, spatial zero-pad (1,1), stride-2
    # polyphase split.  Channels stay at 88 (no 128-lane padding of the big
    # activation tensor -> no extra HBM read bandwidth).
    # TODO(synk): fold this split into the kernel via strided refs.
    x = jnp.transpose(x_nchw, (0, 2, 3, 1))
    xp = jnp.pad(x, ((0, 0), (1, 1), (1, 1), (0, 0)))
    phases = jnp.stack(
        [xp[:, a::2, b::2, :] for a in range(2) for b in range(2)], axis=1
    )  # (N, 4, Ho+1, Wo+1, C)

    # Pad only the OUTPUT-channel side (1x1 weight rows, BN2 params) to 128 so
    # the matmul result and the HBM writeback are lane-dense.
    cpad = CP - c
    w_pw_p = jnp.pad(w_pw_oi, ((0, cpad), (0, 0)))          # (CP, C)
    g1r = g1.reshape(1, c)
    g2p = jnp.pad(g2, (0, cpad)).reshape(1, CP)
    b2p = jnp.pad(b2, (0, cpad)).reshape(1, CP)

    # Explicit VMEM budget with headroom (v5e default scoped limit is 16 MiB;
    # v7x physical VMEM is 64 MiB per TensorCore).
    phase_block = 4 * hph * wph * c * 4
    est = (2 * phase_block            # double-buffered per-image input block
           + 2 * n * ho * wo * c * 4  # y scratch + matmul LHS copy
           + 4 * m * CP * 4           # z / d2 temporaries + resident output
           + 4 * CP * CP * 4          # small weights / folded weights
           + (8 << 20))
    vmem_limit = min(max(est, 24 << 20), 64 << 20)

    kernel = _make_kernel(n, ho, wo, c)
    out_flat = pl.pallas_call(
        kernel,
        out_shape=jax.ShapeDtypeStruct((m, CP), jnp.float32),
        grid=(n,),
        in_specs=[
            pl.BlockSpec((1, 4, hph, wph, c), lambda i: (i, 0, 0, 0, 0)),
            pl.BlockSpec((3, 3, c), lambda i: (0, 0, 0)),
            pl.BlockSpec((1, c), lambda i: (0, 0)),
            pl.BlockSpec((CP, c), lambda i: (0, 0)),
            pl.BlockSpec((1, CP), lambda i: (0, 0)),
            pl.BlockSpec((1, CP), lambda i: (0, 0)),
        ],
        out_specs=pl.BlockSpec((m, CP), lambda i: (0, 0)),
        scratch_shapes=[
            pltpu.VMEM((n * ho, wo, c), jnp.float32),   # depthwise-conv output
            pltpu.VMEM((1, c), jnp.float32),            # BN1 running sum
            pltpu.VMEM((1, c), jnp.float32),            # BN1 running sum-of-squares
        ],
        compiler_params=pltpu.CompilerParams(
            # TODO(synk): decouple BN stats so this axis can be "parallel"
            #             (shards across v7x's two TensorCores).
            dimension_semantics=("arbitrary",),
            vmem_limit_bytes=vmem_limit),
    )(phases, w_dw, g1r, w_pw_p, g2p, b2p)

    out = out_flat.reshape(n, ho, wo, CP)[..., :c]       # drop channel padding
    return jnp.transpose(out, (0, 3, 1, 2))              # NHWC -> NCHW


# Pure-JAX reference (XLA convs) for correctness check.
def reference(x_nchw, params):
    c = x_nchw.shape[1]
    x = jnp.maximum(x_nchw, 0.0)
    w_dw_oihw = jnp.transpose(params["w_dw"], (2, 0, 1))[:, None, :, :]  # (C,1,3,3)
    y = lax.conv_general_dilated(
        x, w_dw_oihw, (2, 2), ((1, 1), (1, 1)),
        dimension_numbers=("NCHW", "OIHW", "NCHW"), feature_group_count=c)

    def bn(t, g, b):
        mu = jnp.mean(t, axis=(0, 2, 3), keepdims=True)
        v = jnp.var(t, axis=(0, 2, 3), keepdims=True)
        return (t - mu) * lax.rsqrt(v + EPS) * g[None, :, None, None] \
            + b[None, :, None, None]

    y = bn(y, params["g1"], params["b1"])
    w_pw_oihw = params["w_pw_oi"][:, :, None, None]                      # (Cout,Cin,1,1)
    z = lax.conv_general_dilated(
        y, w_pw_oihw, (1, 1), ((0, 0), (0, 0)),
        dimension_numbers=("NCHW", "OIHW", "NCHW"))
    return bn(z, params["g2"], params["b2"])


if __name__ == "__main__":
    # C is fixed to 88 by the module's weights; batch/spatial reduced from
    # (1, 88, 56, 56) to (2, 88, 16, 16) for the smoke test.
    N, C, H, W = 2, 88, 16, 16
    key = jax.random.PRNGKey(0)
    ks = jax.random.split(key, 7)
    x = jax.random.normal(ks[0], (N, C, H, W), jnp.float32)
    params = dict(
        w_dw=0.2 * jax.random.normal(ks[1], (3, 3, C), jnp.float32),
        g1=1.0 + 0.1 * jax.random.normal(ks[2], (C,), jnp.float32),
        b1=0.1 * jax.random.normal(ks[3], (C,), jnp.float32),
        w_pw_oi=0.1 * jax.random.normal(ks[4], (C, C), jnp.float32),
        g2=1.0 + 0.1 * jax.random.normal(ks[5], (C,), jnp.float32),
        b2=0.1 * jax.random.normal(ks[6], (C,), jnp.float32),
    )

    out = jax.block_until_ready(jax.jit(forward)(x, params))
    assert out.shape == (N, C, H // 2, W // 2), out.shape

    ref = reference(x, params)
    err = float(jnp.max(jnp.abs(out - ref)))
    assert err < 1e-2, f"max abs error vs reference: {err}"
    print("KERNEL_OK")
</pallas_src>

<mosaic_0001>
module attributes {stable_mosaic.version = 11 : i64} {
  func.func @kernel(%arg0: i32, %arg1: memref<1x4x9x9x88xf32, #tpu.memory_space<vmem>>, %arg2: memref<3x3x88xf32, #tpu.memory_space<vmem>>, %arg3: memref<1x88xf32, #tpu.memory_space<vmem>>, %arg4: memref<128x88xf32, #tpu.memory_space<vmem>>, %arg5: memref<1x128xf32, #tpu.memory_space<vmem>>, %arg6: memref<1x128xf32, #tpu.memory_space<vmem>>, %arg7: memref<128x128xf32, #tpu.memory_space<vmem>>, %arg8: memref<16x8x88xf32, #tpu.memory_space<vmem>>, %arg9: memref<1x88xf32, #tpu.memory_space<vmem>>, %arg10: memref<1x88xf32, #tpu.memory_space<vmem>>) attributes {dimension_semantics = [#tpu.dimension_semantics<arbitrary>], iteration_bounds = array<i64: 2>, scalar_prefetch = 0 : i64, scratch_operands = 3 : i64, tpu.core_type = #tpu.core_type<tc>, window_params = [{transform_indices = @transform_0, window_bounds = array<i64: 1, 4, 9, 9, 88>}, {pipeline_mode = #tpu.pipeline_mode<synchronous>, transform_indices = @transform_1, window_bounds = array<i64: 3, 3, 88>}, {pipeline_mode = #tpu.pipeline_mode<synchronous>, transform_indices = @transform_2, window_bounds = array<i64: 1, 88>}, {pipeline_mode = #tpu.pipeline_mode<synchronous>, transform_indices = @transform_3, window_bounds = array<i64: 128, 88>}, {pipeline_mode = #tpu.pipeline_mode<synchronous>, transform_indices = @transform_4, window_bounds = array<i64: 1, 128>}, {pipeline_mode = #tpu.pipeline_mode<synchronous>, transform_indices = @transform_5, window_bounds = array<i64: 1, 128>}, {pipeline_mode = #tpu.pipeline_mode<synchronous>, transform_indices = @transform_6, window_bounds = array<i64: 128, 128>}]} {
    %c0_i32 = arith.constant 0 : i32
    %0 = arith.cmpi eq, %arg0, %c0_i32 : i32
    %1 = arith.extui %0 : i1 to i32
    %c0_i32_0 = arith.constant 0 : i32
    %2 = arith.cmpi ne, %1, %c0_i32_0 : i32
    scf.if %2 {
      %cst_62 = arith.constant 0.000000e+00 : f32
      %108 = vector.broadcast %cst_62 : f32 to vector<1x88xf32>
      %c0_63 = arith.constant 0 : index
      %c0_64 = arith.constant 0 : index
      %109 = vector.load %arg9[%c0_63, %c0_64] : memref<1x88xf32, #tpu.memory_space<vmem>>, vector<1x88xf32>
      tpu.vector_store %arg9[%c0_63, %c0_64], %108 {strides = array<i32>} : memref<1x88xf32, #tpu.memory_space<vmem>>, vector<1x88xf32>,
      %cst_65 = arith.constant 0.000000e+00 : f32
      %110 = vector.broadcast %cst_65 : f32 to vector<1x88xf32>
      %c0_66 = arith.constant 0 : index
      %c0_67 = arith.constant 0 : index
      %111 = vector.load %arg10[%c0_66, %c0_67] : memref<1x88xf32, #tpu.memory_space<vmem>>, vector<1x88xf32>
      tpu.vector_store %arg10[%c0_66, %c0_67], %110 {strides = array<i32>} : memref<1x88xf32, #tpu.memory_space<vmem>>, vector<1x88xf32>,
    } else {
    }
    %c0 = arith.constant 0 : index
    %c0_1 = arith.constant 0 : index
    %c0_2 = arith.constant 0 : index
    %3 = vector.load %arg2[%c0, %c0_1, %c0_2] : memref<3x3x88xf32, #tpu.memory_space<vmem>>, vector<1x1x88xf32>
    %4 = vector.shape_cast %3 : vector<1x1x88xf32> to vector<88xf32>
    %5 = vector.shape_cast %4 : vector<88xf32> to vector<1x1x88xf32>
    %c0_3 = arith.constant 0 : index
    %c1 = arith.constant 1 : index
    %c0_4 = arith.constant 0 : index
    %6 = vector.load %arg2[%c0_3, %c1, %c0_4] : memref<3x3x88xf32, #tpu.memory_space<vmem>>, vector<1x1x88xf32>
    %7 = vector.shape_cast %6 : vector<1x1x88xf32> to vector<88xf32>
    %8 = vector.shape_cast %7 : vector<88xf32> to vector<1x1x88xf32>
    %c0_5 = arith.constant 0 : index
    %c2 = arith.constant 2 : index
    %c0_6 = arith.constant 0 : index
    %9 = vector.load %arg2[%c0_5, %c2, %c0_6] : memref<3x3x88xf32, #tpu.memory_space<vmem>>, vector<1x1x88xf32>
    %10 = vector.shape_cast %9 : vector<1x1x88xf32> to vector<88xf32>
    %11 = vector.shape_cast %10 : vector<88xf32> to vector<1x1x88xf32>
    %c1_7 = arith.constant 1 : index
    %c0_8 = arith.constant 0 : index
    %c0_9 = arith.constant 0 : index
    %12 = vector.load %arg2[%c1_7, %c0_8, %c0_9] : memref<3x3x88xf32, #tpu.memory_space<vmem>>, vector<1x1x88xf32>
    %13 = vector.shape_cast %12 : vector<1x1x88xf32> to vector<88xf32>
    %14 = vector.shape_cast %13 : vector<88xf32> to vector<1x1x88xf32>
    %c1_10 = arith.constant 1 : index
    %c1_11 = arith.constant 1 : index
    %c0_12 = arith.constant 0 : index
    %15 = vector.load %arg2[%c1_10, %c1_11, %c0_12] : memref<3x3x88xf32, #tpu.memory_space<vmem>>, vector<1x1x88xf32>
    %16 = vector.shape_cast %15 : vector<1x1x88xf32> to vector<88xf32>
    %17 = vector.shape_cast %16 : vector<88xf32> to vector<1x1x88xf32>
    %c1_13 = arith.constant 1 : index
    %c2_14 = arith.constant 2 : index
    %c0_15 = arith.constant 0 : index
    %18 = vector.load %arg2[%c1_13, %c2_14, %c0_15] : memref<3x3x88xf32, #tpu.memory_space<vmem>>, vector<1x1x88xf32>
    %19 = vector.shape_cast %18 : vector<1x1x88xf32> to vector<88xf32>
    %20 = vector.shape_cast %19 : vector<88xf32> to vector<1x1x88xf32>
    %c2_16 = arith.constant 2 : index
    %c0_17 = arith.constant 0 : index
    %c0_18 = arith.constant 0 : index
    %21 = vector.load %arg2[%c2_16, %c0_17, %c0_18] : memref<3x3x88xf32, #tpu.memory_space<vmem>>, vector<1x1x88xf32>
    %22 = vector.shape_cast %21 : vector<1x1x88xf32> to vector<88xf32>
    %23 = vector.shape_cast %22 : vector<88xf32> to vector<1x1x88xf32>
    %c2_19 = arith.constant 2 : index
    %c1_20 = arith.constant 1 : index
    %c0_21 = arith.constant 0 : index
    %24 = vector.load %arg2[%c2_19, %c1_20, %c0_21] : memref<3x3x88xf32, #tpu.memory_space<vmem>>, vector<1x1x88xf32>
    %25 = vector.shape_cast %24 : vector<1x1x88xf32> to vector<88xf32>
    %26 = vector.shape_cast %25 : vector<88xf32> to vector<1x1x88xf32>
    %c2_22 = arith.constant 2 : index
    %c2_23 = arith.constant 2 : index
    %c0_24 = arith.constant 0 : index
    %27 = vector.load %arg2[%c2_22, %c2_23, %c0_24] : memref<3x3x88xf32, #tpu.memory_space<vmem>>, vector<1x1x88xf32>
    %28 = vector.shape_cast %27 : vector<1x1x88xf32> to vector<88xf32>
    %29 = vector.shape_cast %28 : vector<88xf32> to vector<1x1x88xf32>
    %cst = arith.constant 0.000000e+00 : f32
    %30 = vector.broadcast %cst : f32 to vector<8x8x88xf32>
    %c0_25 = arith.constant 0 : index
    %c0_26 = arith.constant 0 : index
    %c0_27 = arith.constant 0 : index
    %c0_28 = arith.constant 0 : index
    %c0_29 = arith.constant 0 : index
    %31 = vector.load %arg1[%c0_25, %c0_26, %c0_27, %c0_28, %c0_29] : memref<1x4x9x9x88xf32, #tpu.memory_space<vmem>>, vector<1x1x9x9x88xf32>
    %32 = vector.shape_cast %31 : vector<1x1x9x9x88xf32> to vector<9x9x88xf32>
    %cst_30 = arith.constant 0.000000e+00 : f32
    %33 = vector.broadcast %cst_30 : f32 to vector<9x9x88xf32>
    %34 = arith.maximumf %32, %33 : vector<9x9x88xf32>
    %35 = vector.extract_strided_slice %34 {offsets = [0, 0, 0], sizes = [9, 8, 88], strides = [1, 1, 1]} : vector<9x9x88xf32> to vector<9x8x88xf32>
    %36 = vector.extract_strided_slice %34 {offsets = [0, 1, 0], sizes = [9, 8, 88], strides = [1, 1, 1]} : vector<9x9x88xf32> to vector<9x8x88xf32>
    %37 = vector.extract_strided_slice %35 {offsets = [0, 0, 0], sizes = [8, 8, 88], strides = [1, 1, 1]} : vector<9x8x88xf32> to vector<8x8x88xf32>
    %38 = vector.broadcast %5 : vector<1x1x88xf32> to vector<8x8x88xf32>
    %39 = arith.mulf %37, %38 : vector<8x8x88xf32>
    %40 = arith.addf %30, %39 : vector<8x8x88xf32>
    %41 = vector.extract_strided_slice %36 {offsets = [0, 0, 0], sizes = [8, 8, 88], strides = [1, 1, 1]} : vector<9x8x88xf32> to vector<8x8x88xf32>
    %42 = vector.broadcast %11 : vector<1x1x88xf32> to vector<8x8x88xf32>
    %43 = arith.mulf %41, %42 : vector<8x8x88xf32>
    %44 = arith.addf %40, %43 : vector<8x8x88xf32>
    %45 = vector.extract_strided_slice %35 {offsets = [1, 0, 0], sizes = [8, 8, 88], strides = [1, 1, 1]} : vector<9x8x88xf32> to vector<8x8x88xf32>
    %46 = vector.broadcast %23 : vector<1x1x88xf32> to vector<8x8x88xf32>
    %47 = arith.mulf %45, %46 : vector<8x8x88xf32>
    %48 = arith.addf %44, %47 : vector<8x8x88xf32>
    %49 = vector.extract_strided_slice %36 {offsets = [1, 0, 0], sizes = [8, 8, 88], strides = [1, 1, 1]} : vector<9x8x88xf32> to vector<8x8x88xf32>
    %50 = vector.broadcast %29 : vector<1x1x88xf32> to vector<8x8x88xf32>
    %51 = arith.mulf %49, %50 : vector<8x8x88xf32>
    %52 = arith.addf %48, %51 : vector<8x8x88xf32>
    %c0_31 = arith.constant 0 : index
    %c1_32 = arith.constant 1 : index
    %c0_33 = arith.constant 0 : index
    %c0_34 = arith.constant 0 : index
    %c0_35 = arith.constant 0 : index
    %53 = vector.load %arg1[%c0_31, %c1_32, %c0_33, %c0_34, %c0_35] : memref<1x4x9x9x88xf32, #tpu.memory_space<vmem>>, vector<1x1x9x9x88xf32>
    %54 = vector.shape_cast %53 : vector<1x1x9x9x88xf32> to vector<9x9x88xf32>
    %cst_36 = arith.constant 0.000000e+00 : f32
    %55 = vector.broadcast %cst_36 : f32 to vector<9x9x88xf32>
    %56 = arith.maximumf %54, %55 : vector<9x9x88xf32>
    %57 = vector.extract_strided_slice %56 {offsets = [0, 0, 0], sizes = [9, 8, 88], strides = [1, 1, 1]} : vector<9x9x88xf32> to vector<9x8x88xf32>
    %58 = vector.extract_strided_slice %57 {offsets = [0, 0, 0], sizes = [8, 8, 88], strides = [1, 1, 1]} : vector<9x8x88xf32> to vector<8x8x88xf32>
    %59 = vector.broadcast %8 : vector<1x1x88xf32> to vector<8x8x88xf32>
    %60 = arith.mulf %58, %59 : vector<8x8x88xf32>
    %61 = arith.addf %52, %60 : vector<8x8x88xf32>
    %62 = vector.extract_strided_slice %57 {offsets = [1, 0, 0], sizes = [8, 8, 88], strides = [1, 1, 1]} : vector<9x8x88xf32> to vector<8x8x88xf32>
    %63 = vector.broadcast %26 : vector<1x1x88xf32> to vector<8x8x88xf32>
    %64 = arith.mulf %62, %63 : vector<8x8x88xf32>
    %65 = arith.addf %61, %64 : vector<8x8x88xf32>
    %c0_37 = arith.constant 0 : index
    %c2_38 = arith.constant 2 : index
    %c0_39 = arith.constant 0 : index
    %c0_40 = arith.constant 0 : index
    %c0_41 = arith.constant 0 : index
    %66 = vector.load %arg1[%c0_37, %c2_38, %c0_39, %c0_40, %c0_41] : memref<1x4x9x9x88xf32, #tpu.memory_space<vmem>>, vector<1x1x9x9x88xf32>
    %67 = vector.shape_cast %66 : vector<1x1x9x9x88xf32> to vector<9x9x88xf32>
    %cst_42 = arith.constant 0.000000e+00 : f32
    %68 = vector.broadcast %cst_42 : f32 to vector<9x9x88xf32>
    %69 = arith.maximumf %67, %68 : vector<9x9x88xf32>
    %70 = vector.extract_strided_slice %69 {offsets = [0, 0, 0], sizes = [9, 8, 88], strides = [1, 1, 1]} : vector<9x9x88xf32> to vector<9x8x88xf32>
    %71 = vector.extract_strided_slice %69 {offsets = [0, 1, 0], sizes = [9, 8, 88], strides = [1, 1, 1]} : vector<9x9x88xf32> to vector<9x8x88xf32>
    %72 = vector.extract_strided_slice %70 {offsets = [0, 0, 0], sizes = [8, 8, 88], strides = [1, 1, 1]} : vector<9x8x88xf32> to vector<8x8x88xf32>
    %73 = vector.broadcast %14 : vector<1x1x88xf32> to vector<8x8x88xf32>
    %74 = arith.mulf %72, %73 : vector<8x8x88xf32>
    %75 = arith.addf %65, %74 : vector<8x8x88xf32>
    %76 = vector.extract_strided_slice %71 {offsets = [0, 0, 0], sizes = [8, 8, 88], strides = [1, 1, 1]} : vector<9x8x88xf32> to vector<8x8x88xf32>
    %77 = vector.broadcast %20 : vector<1x1x88xf32> to vector<8x8x88xf32>
    %78 = arith.mulf %76, %77 : vector<8x8x88xf32>
    %79 = arith.addf %75, %78 : vector<8x8x88xf32>
    %c0_43 = arith.constant 0 : index
    %c3 = arith.constant 3 : index
    %c0_44 = arith.constant 0 : index
    %c0_45 = arith.constant 0 : index
    %c0_46 = arith.constant 0 : index
    %80 = vector.load %arg1[%c0_43, %c3, %c0_44, %c0_45, %c0_46] : memref<1x4x9x9x88xf32, #tpu.memory_space<vmem>>, vector<1x1x9x9x88xf32>
    %81 = vector.shape_cast %80 : vector<1x1x9x9x88xf32> to vector<9x9x88xf32>
    %cst_47 = arith.constant 0.000000e+00 : f32
    %82 = vector.broadcast %cst_47 : f32 to vector<9x9x88xf32>
    %83 = arith.maximumf %81, %82 : vector<9x9x88xf32>
    %84 = vector.extract_strided_slice %83 {offsets = [0, 0, 0], sizes = [9, 8, 88], strides = [1, 1, 1]} : vector<9x9x88xf32> to vector<9x8x88xf32>
    %85 = vector.extract_strided_slice %84 {offsets = [0, 0, 0], sizes = [8, 8, 88], strides = [1, 1, 1]} : vector<9x8x88xf32> to vector<8x8x88xf32>
    %86 = vector.broadcast %17 : vector<1x1x88xf32> to vector<8x8x88xf32>
    %87 = arith.mulf %85, %86 : vector<8x8x88xf32>
    %88 = arith.addf %79, %87 : vector<8x8x88xf32>
    %c0_48 = arith.constant 0 : index
    %c0_49 = arith.constant 0 : index
    %89 = vector.load %arg9[%c0_48, %c0_49] : memref<1x88xf32, #tpu.memory_space<vmem>>, vector<1x88xf32>
    %cst_50 = arith.constant dense<0.000000e+00> : vector<88xf32>
    %90 = vector.multi_reduction <add>, %88, %cst_50 [0, 1] : vector<8x8x88xf32> to vector<88xf32>
    %91 = vector.shape_cast %90 : vector<88xf32> to vector<1x88xf32>
    %92 = arith.addf %89, %91 : vector<1x88xf32>
    %c0_51 = arith.constant 0 : index
    %c0_52 = arith.constant 0 : index
    %93 = vector.load %arg9[%c0_51, %c0_52] : memref<1x88xf32, #tpu.memory_space<vmem>>, vector<1x88xf32>
    tpu.vector_store %arg9[%c0_51, %c0_52], %92 {strides = array<i32>} : memref<1x88xf32, #tpu.memory_space<vmem>>, vector<1x88xf32>,
    %c0_53 = arith.constant 0 : index
    %c0_54 = arith.constant 0 : index
    %94 = vector.load %arg10[%c0_53, %c0_54] : memref<1x88xf32, #tpu.memory_space<vmem>>, vector<1x88xf32>
    %95 = arith.mulf %88, %88 : vector<8x8x88xf32>
    %cst_55 = arith.constant dense<0.000000e+00> : vector<88xf32>
    %96 = vector.multi_reduction <add>, %95, %cst_55 [0, 1] : vector<8x8x88xf32> to vector<88xf32>
    %97 = vector.shape_cast %96 : vector<88xf32> to vector<1x88xf32>
    %98 = arith.addf %94, %97 : vector<1x88xf32>
    %c0_56 = arith.constant 0 : index
    %c0_57 = arith.constant 0 : index
    %99 = vector.load %arg10[%c0_56, %c0_57] : memref<1x88xf32, #tpu.memory_space<vmem>>, vector<1x88xf32>
    tpu.vector_store %arg10[%c0_56, %c0_57], %98 {strides = array<i32>} : memref<1x88xf32, #tpu.memory_space<vmem>>, vector<1x88xf32>,
    %c8_i32 = arith.constant 8 : i32
    %100 = arith.muli %arg0, %c8_i32 : i32
    %c0_i32_58 = arith.constant 0 : i32
    %101 = arith.addi %100, %c0_i32_58 : i32
    %102 = tpu.assume_multiple %101, 8 : i32
    %103 = arith.index_cast %102 : i32 to index
    %c0_59 = arith.constant 0 : index
    %c0_60 = arith.constant 0 : index
    %104 = vector.load %arg8[%103, %c0_59, %c0_60] : memref<16x8x88xf32, #tpu.memory_space<vmem>>, vector<8x8x88xf32>
    tpu.vector_store %arg8[%103, %c0_59, %c0_60], %88 {strides = array<i32>} : memref<16x8x88xf32, #tpu.memory_space<vmem>>, vector<8x8x88xf32>,
    %c1_i32 = arith.constant 1 : i32
    %105 = arith.cmpi eq, %arg0, %c1_i32 : i32
    %106 = arith.extui %105 : i1 to i32
    %c0_i32_61 = arith.constant 0 : i32
    %107 = arith.cmpi ne, %106, %c0_i32_61 : i32
    scf.if %107 {
      %c0_62 = arith.constant 0 : index
      %c0_63 = arith.constant 0 : index
      %108 = vector.load %arg9[%c0_62, %c0_63] : memref<1x88xf32, #tpu.memory_space<vmem>>, vector<1x88xf32>
      %cst_64 = arith.constant 7.812500e-03 : f32
      %109 = vector.broadcast %cst_64 : f32 to vector<1x88xf32>
      %110 = arith.mulf %108, %109 : vector<1x88xf32>
      %c0_65 = arith.constant 0 : index
      %c0_66 = arith.constant 0 : index
      %111 = vector.load %arg10[%c0_65, %c0_66] : memref<1x88xf32, #tpu.memory_space<vmem>>, vector<1x88xf32>
      %cst_67 = arith.constant 7.812500e-03 : f32
      %112 = vector.broadcast %cst_67 : f32 to vector<1x88xf32>
      %113 = arith.mulf %111, %112 : vector<1x88xf32>
      %114 = arith.mulf %110, %110 : vector<1x88xf32>
      %115 = arith.subf %113, %114 : vector<1x88xf32>
      %c0_68 = arith.constant 0 : index
      %c0_69 = arith.constant 0 : index
      %116 = vector.load %arg3[%c0_68, %c0_69] : memref<1x88xf32, #tpu.memory_space<vmem>>, vector<1x88xf32>
      %cst_70 = arith.constant 9.99999974E-6 : f32
      %117 = vector.broadcast %cst_70 : f32 to vector<1x88xf32>
      %118 = arith.addf %115, %117 : vector<1x88xf32>
      %119 = math.rsqrt %118 : vector<1x88xf32>
      %120 = arith.mulf %116, %119 : vector<1x88xf32>
      %c0_71 = arith.constant 0 : index
      %c0_72 = arith.constant 0 : index
      %121 = vector.load %arg4[%c0_71, %c0_72] : memref<128x88xf32, #tpu.memory_space<vmem>>, vector<128x88xf32>
      %122 = vector.broadcast %120 : vector<1x88xf32> to vector<128x88xf32>
      %123 = arith.mulf %121, %122 : vector<128x88xf32>
      %c0_73 = arith.constant 0 : index
      %c0_74 = arith.constant 0 : index
      %c0_75 = arith.constant 0 : index
      %124 = vector.load %arg8[%c0_73, %c0_74, %c0_75] : memref<16x8x88xf32, #tpu.memory_space<vmem>>, vector<16x8x88xf32>
      %125 = vector.shape_cast %124 : vector<16x8x88xf32> to vector<128x88xf32>
      %cst_76 = arith.constant dense<0.000000e+00> : vector<128x128xf32>
      %126 = tpu.matmul %125, %123, %cst_76 {dimension_numbers = #tpu.dot_dimension_numbers<[1], [1], [0], [0], [0, 0, 1, 0], [], []>} : vector<128x88xf32>, vector<128x88xf32>, vector<128x128xf32> -> vector<128x128xf32>
      %cst_77 = arith.constant dense<0.000000e+00> : vector<128xf32>
      %127 = vector.multi_reduction <add>, %126, %cst_77 [0] : vector<128x128xf32> to vector<128xf32>
      %128 = vector.shape_cast %127 : vector<128xf32> to vector<1x128xf32>
      %cst_78 = arith.constant 7.812500e-03 : f32
      %129 = vector.broadcast %cst_78 : f32 to vector<1x128xf32>
      %130 = arith.mulf %128, %129 : vector<1x128xf32>
      %131 = vector.broadcast %130 : vector<1x128xf32> to vector<128x128xf32>
      %132 = arith.subf %126, %131 : vector<128x128xf32>
      %133 = arith.mulf %132, %132 : vector<128x128xf32>
      %cst_79 = arith.constant dense<0.000000e+00> : vector<128xf32>
      %134 = vector.multi_reduction <add>, %133, %cst_79 [0] : vector<128x128xf32> to vector<128xf32>
      %135 = vector.shape_cast %134 : vector<128xf32> to vector<1x128xf32>
      %cst_80 = arith.constant 7.812500e-03 : f32
      %136 = vector.broadcast %cst_80 : f32 to vector<1x128xf32>
      %137 = arith.mulf %135, %136 : vector<1x128xf32>
      %c0_81 = arith.constant 0 : index
      %c0_82 = arith.constant 0 : index
      %138 = vector.load %arg5[%c0_81, %c0_82] : memref<1x128xf32, #tpu.memory_space<vmem>>, vector<1x128xf32>
      %cst_83 = arith.constant 9.99999974E-6 : f32
      %139 = vector.broadcast %cst_83 : f32 to vector<1x128xf32>
      %140 = arith.addf %137, %139 : vector<1x128xf32>
      %141 = math.rsqrt %140 : vector<1x128xf32>
      %142 = arith.mulf %138, %141 : vector<1x128xf32>
      %143 = vector.broadcast %142 : vector<1x128xf32> to vector<128x128xf32>
      %144 = arith.mulf %132, %143 : vector<128x128xf32>
      %c0_84 = arith.constant 0 : index
      %c0_85 = arith.constant 0 : index
      %145 = vector.load %arg6[%c0_84, %c0_85] : memref<1x128xf32, #tpu.memory_space<vmem>>, vector<1x128xf32>
      %146 = vector.broadcast %145 : vector<1x128xf32> to vector<128x128xf32>
      %147 = arith.addf %144, %146 : vector<128x128xf32>
      %c0_86 = arith.constant 0 : index
      %c0_87 = arith.constant 0 : index
      %148 = vector.load %arg7[%c0_86, %c0_87] : memref<128x128xf32, #tpu.memory_space<vmem>>, vector<128x128xf32>
      tpu.vector_store %arg7[%c0_86, %c0_87], %147 {strides = array<i32>} : memref<128x128xf32, #tpu.memory_space<vmem>>, vector<128x128xf32>,
    } else {
    }
    return
  }
  func.func @transform_0(%arg0: i32) -> (i32, i32, i32, i32, i32) {
    %c0_i32 = arith.constant 0 : i32
    %c0_i32_0 = arith.constant 0 : i32
    %c0_i32_1 = arith.constant 0 : i32
    %c0_i32_2 = arith.constant 0 : i32
    %c0_i32_3 = arith.constant 0 : i32
    return %arg0, %c0_i32, %c0_i32_0, %c0_i32_1, %c0_i32_2 : i32, i32, i32, i32, i32
  }
  func.func @transform_1(%arg0: i32) -> (i32, i32, i32) {
    %c0_i32 = arith.constant 0 : i32
    %c0_i32_0 = arith.constant 0 : i32
    %c0_i32_1 = arith.constant 0 : i32
    %c0_i32_2 = arith.constant 0 : i32
    return %c0_i32, %c0_i32_0, %c0_i32_1 : i32, i32, i32
  }
  func.func @transform_2(%arg0: i32) -> (i32, i32) {
    %c0_i32 = arith.constant 0 : i32
    %c0_i32_0 = arith.constant 0 : i32
    %c0_i32_1 = arith.constant 0 : i32
    return %c0_i32, %c0_i32_0 : i32, i32
  }
  func.func @transform_3(%arg0: i32) -> (i32, i32) {
    %c0_i32 = arith.constant 0 : i32
    %c0_i32_0 = arith.constant 0 : i32
    %c0_i32_1 = arith.constant 0 : i32
    return %c0_i32, %c0_i32_0 : i32, i32
  }
  func.func @transform_4(%arg0: i32) -> (i32, i32) {
    %c0_i32 = arith.constant 0 : i32
    %c0_i32_0 = arith.constant 0 : i32
    %c0_i32_1 = arith.constant 0 : i32
    return %c0_i32, %c0_i32_0 : i32, i32
  }
  func.func @transform_5(%arg0: i32) -> (i32, i32) {
    %c0_i32 = arith.constant 0 : i32
    %c0_i32_0 = arith.constant 0 : i32
    %c0_i32_1 = arith.constant 0 : i32
    return %c0_i32, %c0_i32_0 : i32, i32
  }
  func.func @transform_6(%arg0: i32) -> (i32, i32) {
    %c0_i32 = arith.constant 0 : i32
    %c0_i32_0 = arith.constant 0 : i32
    %c0_i32_1 = arith.constant 0 : i32
    return %c0_i32, %c0_i32_0 : i32, i32
  }
}

</mosaic_0001>

<bundles_post_ra>
// kernel: forward.1
= control target key start
LH: loop header
LB: loop body
LE: loop exit
PB: predicated region body
PF: predicated region fallthrough
CT: control target
= control target key end

     0   :  { %s1359_s21 = smov 0   ;;  %s1906_s0 = inlined_call_operand.vmem [shape: f32[2,4,9,9,88], index: 0, kind: input, shape index: {}]   ;;  %s1907_s1 = inlined_call_operand.vmem [shape: f32[3,3,88], index: 1, kind: input, shape index: {}]   ;;  %s1908_s2 = inlined_call_operand.vmem [shape: f32[1,88], index: 2, kind: input, shape index: {}]   ;;  %s1909_s3 = inlined_call_operand.vmem [shape: f32[128,88], index: 3, kind: input, shape index: {}]   ;;  %s1910_s4 = inlined_call_operand.vmem [shape: f32[1,128], index: 4, kind: input, shape index: {}]   ;;  %s1911_s5 = inlined_call_operand.vmem [shape: f32[1,128], index: 5, kind: input, shape index: {}]   ;;  %s1912_s6 = inlined_call_operand.vmem [shape: f32[128,128], index: 6, kind: output, shape index: {}]  }
   0x1 LB: > { %s1365_s22 = sadd.s32 4294967295, %s1321_s21   ;;  %p1163_p0 = scmp.ge.s32.totalorder %s1321_s21, 1  ;;  %s1321_s21 = sphi %s1359_s21, %s16_s21  }
   0x2   : > { %p207_p1 = scmp.lt.s32.totalorder %s1321_s21, 3 }
   0x4   : > { %p208_p2 = pnand %p1163_p0, %p207_p1 }
   0x5   : > { %p232_p3 = scmp.lt.s32.totalorder (!%p208_p2), %s1365_s22, 1  ;;  %p1165_p4 = scmp.ne.s32.totalorder (!%p208_p2), %s1365_s22, 0 }
   0x6   : > { %211 = sbr.rel (%p208_p2) target bundleno = 510 (0x1fe), region = 44 }
   0xb   : > { %s233_s23 = scalar_select %p232_p3, %s1365_s22, 1 }
   0xc   : > { %240 = sbr.rel (%p1165_p4) target bundleno = 20 (0x14), region = 48 }
   0xd   : > { %s1291_s24 = smul.u32 576, %s233_s23 }
   0xf   : > { %s1374_s27 = scalar_lea.vmem %s1906_s0, %s1291_s24 }
  0x11   : > { %vm241_vm0 = vcmask 712704   ;;  %v1323_v0 = vmov 0.0  }
  0x12   : > { %242 = vst.msk [vmem:[#allocation3] sm:$0x1] %vm241_vm0, %v1323_v0 }
  0x13   : > { %243 = vst.msk [vmem:[#allocation4] sm:$0x1] %vm241_vm0, %v1323_v0 }
  0x14 PF: > { %v255_v1 = vld [vmem:[%s1374_s27] sm:$0xff]  ;;  %v256_v2 = vld [vmem:[%s1374_s27 + $0x8] sm:$0x1]  ;;  %v257_v3 = vld [vmem:[%s1374_s27 + $0x10] sm:$0xff]  ;;  %vm341_vm1 = vcmask 1046528   ;;  %s1242_s24 = sshll.u32 %s1365_s22, 6 }
  0x15   : > { %v1381_v4 = vld [vmem:[%s1374_s27 + $0x18] sm:$0x1]  ;;  %v259_v5 = vld [vmem:[%s1374_s27 + $0x20] sm:$0xff]  ;;  %v1385_v6 = vld [vmem:[%s1374_s27 + $0x28] sm:$0x1]  ;;  %v273_v7 = vmax.f32 %v255_v1, 0.0 }
  0x16   : > { %v261_v8 = vld [vmem:[%s1374_s27 + $0x30] sm:$0xff]  ;;  %v1389_v9 = vld [vmem:[%s1374_s27 + $0x38] sm:$0x1]  ;;  %v263_v10 = vld [vmem:[%s1374_s27 + $0x40] sm:$0xff]  ;;  %v274_v11 = vmax.f32 %v256_v2, 0.0  ;;  %v1392_v12 = vmax.f32 %v257_v3, 0.0 }
  0x17   : > { %v1395_v13 = vld [vmem:[%s1374_s27 + $0x48] sm:$0x1]  ;;  %v265_v14 = vld [vmem:[%s1374_s27 + $0x50] sm:$0xff]  ;;  %v1399_v15 = vld [vmem:[%s1374_s27 + $0x58] sm:$0x1]  ;;  %v276_v16 = vmax.f32 %v1381_v4, 0.0 }
  0x18   : > { %v267_v17 = vld [vmem:[%s1374_s27 + $0x60] sm:$0xff]  ;;  %v1404_v18 = vld [vmem:[%s1374_s27 + $0x68] sm:$0x1]  ;;  %v269_v19 = vld [vmem:[%s1374_s27 + $0x70] sm:$0xff]  ;;  %v1407_v20 = vmax.f32 %v259_v5, 0.0  ;;  %v278_v21 = vmax.f32 %v1385_v6, 0.0 }
  0x19   : > { %v1411_v22 = vld [vmem:[%s1374_s27 + $0x78] sm:$0x1]  ;;  %v1414_v23 = vld [vmem:[%s1374_s27 + $0x80] sm:$0xff]  ;;  %v1417_v24 = vld [vmem:[%s1374_s27 + $0x88] sm:$0x1]  ;;  %v1419_v25 = vmax.f32 %v261_v8, 0.0 }
  0x1a   : > { %v280_v26 = vmax.f32 %v1389_v9, 0.0  ;;  %v1422_v27 = vmax.f32 %v263_v10, 0.0  ;;  %v282_v28 = vmax.f32 %v1395_v13, 0.0  ;;  %v1425_v29 = vmax.f32 %v265_v14, 0.0  ;;  %v1301_v30 = vld [vmem:[%s1907_s1] ss:$0 sm:$0xff] }
  0x1b   : > { %v284_v31 = vmax.f32 %v1399_v15, 0.0  ;;  %v1431_v32 = vmax.f32 %v267_v17, 0.0  ;;  %v286_v33 = vmax.f32 %v1404_v18, 0.0  ;;  %v1434_v34 = vmax.f32 %v269_v19, 0.0  ;;  %v1302_v35 = vld [vmem:[%s1907_s1 + $0x2] ss:$0 sm:$0xff] }
  0x1c   : > { %v288_v36 = vmax.f32 %v1411_v22, 0.0  ;;  %v289_v37 = vmax.f32 %v1414_v23, 0.0  ;;  %v292_v39 = vmul.f32 %v1301_v30, %v273_v7  ;;  %v293_v40 = vmul.f32 %v1301_v30, %v1392_v12  ;;  %s742_s25 = scalar_lea.vmem [#allocation2], %s1242_s24  ;;  %p1207_p5 = scmp.ne.s32.totalorder %s1365_s22, 1 }
  0x1d   : > { %v294_v41 = vmul.f32 %v1301_v30, %v1407_v20  ;;  %v295_v42 = vmul.f32 %v1301_v30, %v1419_v25  ;;  %v296_v43 = vmul.f32 %v1301_v30, %v1422_v27  ;;  %v297_v44 = vmul.f32 %v1301_v30, %v1425_v29 }
  0x1e   : > { %v298_v45 = vmul.f32 %v1301_v30, %v1431_v32  ;;  %v299_v46 = vmul.f32 %v1301_v30, %v1434_v34  ;;  %v309_v47 = vmul.f32 %v1302_v35, %v273_v7  ;;  %v310_v48 = vmul.f32 %v1302_v35, %v274_v11 }
  0x1f   : > { %v311_v49 = vmul.f32 %v1302_v35, %v1392_v12  ;;  %v312_v50 = vmul.f32 %v1302_v35, %v276_v16  ;;  %v313_v51 = vmul.f32 %v1302_v35, %v1407_v20  ;;  %v314_v52 = vmul.f32 %v1302_v35, %v278_v21 }
  0x20   : > { %v315_v53 = vmul.f32 %v1302_v35, %v1419_v25  ;;  %v316_v54 = vmul.f32 %v1302_v35, %v280_v26  ;;  %v317_v55 = vmul.f32 %v1302_v35, %v1422_v27  ;;  %v318_v56 = vmul.f32 %v1302_v35, %v282_v28 }
  0x21   : > { %v319_v57 = vmul.f32 %v1302_v35, %v1425_v29  ;;  %v320_v58 = vmul.f32 %v1302_v35, %v284_v31  ;;  %v321_v59 = vmul.f32 %v1302_v35, %v1431_v32  ;;  %v322_v60 = vmul.f32 %v1302_v35, %v286_v33 }
  0x22   : > { %v323_v61 = vmul.f32 %v1302_v35, %v1434_v34  ;;  %v324_v62 = vmul.f32 %v1302_v35, %v288_v36  ;;  %v342_v63 = vrot.slane %v309_v47, 1  ;;  %v343_v0 = vrot.slane %v310_v48, 1  ;;  %v1303_v48 = vld [vmem:[%s1907_s1 + $0x8] ss:$0 sm:$0xff] }
  0x23   : > { %v345_v1 = vrot.slane %v311_v49, 1  ;;  %v346_v2 = vrot.slane %v312_v50, 1  ;;  %v348_v3 = vrot.slane %v313_v51, 1  ;;  %v349_v5 = vrot.slane %v314_v52, 1 }
  0x24   : > { %v351_v7 = vrot.slane %v315_v53, 1  ;;  %v352_v8 = vrot.slane %v316_v54, 1  ;;  %v354_v10 = vrot.slane %v317_v55, 1  ;;  %v344_v11 = vsel %vm341_vm1, %v342_v63, %v343_v0 }
  0x25   : > { %v347_v14 = vsel %vm341_vm1, %v345_v1, %v346_v2  ;;  %v355_v17 = vrot.slane %v318_v56, 1  ;;  %v357_v19 = vrot.slane %v319_v57, 1  ;;  %v350_v30 = vsel %vm341_vm1, %v348_v3, %v349_v5 }
  0x26   : > { %v353_v38 = vsel %vm341_vm1, %v351_v7, %v352_v8  ;;  %v358_v35 = vrot.slane %v320_v58, 1  ;;  %v360_v47 = vrot.slane %v321_v59, 1  ;;  %v361_v50 = vrot.slane %v322_v60, 1  ;;  %v1304_v60 = vld [vmem:[%s1907_s1 + $0xa] ss:$0 sm:$0xff] }
  0x27   : > { %v356_v49 = vsel %vm341_vm1, %v354_v10, %v355_v17  ;;  %v363_v51 = vrot.slane %v323_v61, 1  ;;  %v364_v52 = vrot.slane %v324_v62, 1  ;;  %v374_v54 = vadd.f32 %v344_v11, %v292_v39 }
  0x28   : > { %v359_v53 = vsel %vm341_vm1, %v357_v19, %v358_v35  ;;  %v375_v55 = vadd.f32 %v347_v14, %v293_v40  ;;  %v376_v56 = vadd.f32 %v350_v30, %v294_v41  ;;  %v362_v57 = vsel %vm341_vm1, %v360_v47, %v361_v50 }
  0x29   : > { %v365_v63 = vsel %vm341_vm1, %v363_v51, %v364_v52  ;;  %v377_v58 = vadd.f32 %v353_v38, %v295_v42  ;;  %v378_v59 = vadd.f32 %v356_v49, %v296_v43  ;;  %v379_v0 = vadd.f32 %v359_v53, %v297_v44  ;;  %v1172_v51 = vld [vmem:[%s1374_s27 + $0x90] sm:$0xff] }
  0x2a   : > { %v380_v1 = vadd.f32 %v362_v57, %v298_v45  ;;  %v381_v2 = vadd.f32 %v365_v63, %v299_v46  ;;  %v383_v3 = vmul.f32 %v1303_v48, %v1392_v12  ;;  %v384_v61 = vmul.f32 %v1303_v48, %v1407_v20  ;;  %v1174_v57 = vld [vmem:[%s1374_s27 + $0xb0] sm:$0xff]  ;;  %v1175_v63 = vld [vmem:[%s1374_s27 + $0xc0] sm:$0xff] }
  0x2b   : > { %v385_v39 = vmul.f32 %v1303_v48, %v1419_v25  ;;  %v386_v40 = vmul.f32 %v1303_v48, %v1422_v27  ;;  %v387_v41 = vmul.f32 %v1303_v48, %v1425_v29  ;;  %v388_v38 = vmul.f32 %v1303_v48, %v1431_v32 }
  0x2c   : > { %v389_v42 = vmul.f32 %v1303_v48, %v1434_v34  ;;  %v390_v43 = vmul.f32 %v1303_v48, %v289_v37  ;;  %v391_v44 = vadd.f32 %v383_v3, %v374_v54  ;;  %v392_v45 = vadd.f32 %v384_v61, %v375_v55  ;;  %v1177_v3 = vld [vmem:[%s1374_s27 + $0xe0] sm:$0xff] }
  0x2d   : > { %v393_v46 = vadd.f32 %v385_v39, %v376_v56  ;;  %v394_v62 = vadd.f32 %v386_v40, %v377_v58  ;;  %v395_v5 = vadd.f32 %v387_v41, %v378_v59  ;;  %v396_v7 = vadd.f32 %v388_v38, %v379_v0  ;;  %v1173_v56 = vld [vmem:[%s1374_s27 + $0xa0] sm:$0xff] }
  0x2e   : > { %v397_v8 = vadd.f32 %v389_v42, %v380_v1  ;;  %v398_v10 = vadd.f32 %v390_v43, %v381_v2  ;;  %v400_v11 = vmul.f32 %v1304_v60, %v1392_v12  ;;  %v401_v14 = vmul.f32 %v1304_v60, %v276_v16  ;;  %v1176_v2 = vld [vmem:[%s1374_s27 + $0xd0] sm:$0xff]  ;;  %v1179_v38 = vld [vmem:[%s1374_s27 + $0x100] sm:$0xff] }
  0x2f   : > { %v402_v17 = vmul.f32 %v1304_v60, %v1407_v20  ;;  %v403_v19 = vmul.f32 %v1304_v60, %v278_v21  ;;  %v404_v30 = vmul.f32 %v1304_v60, %v1419_v25  ;;  %v405_v35 = vmul.f32 %v1304_v60, %v280_v26  ;;  %v1180_v42 = vld [vmem:[%s1374_s27 + $0x110] sm:$0xff]  ;;  %v1305_v43 = vld [vmem:[%s1907_s1 + $0x1] ss:$0 sm:$0xff] }
  0x30   : > { %v406_v47 = vmul.f32 %v1304_v60, %v1422_v27  ;;  %v407_v48 = vmul.f32 %v1304_v60, %v282_v28  ;;  %v408_v12 = vmul.f32 %v1304_v60, %v1425_v29  ;;  %v409_v4 = vmul.f32 %v1304_v60, %v284_v31 }
  0x31   : > { %v410_v16 = vmul.f32 %v1304_v60, %v1431_v32  ;;  %v411_v6 = vmul.f32 %v1304_v60, %v286_v33  ;;  %v412_v20 = vmul.f32 %v1304_v60, %v1434_v34  ;;  %v413_v9 = vmul.f32 %v1304_v60, %v288_v36 }
  0x32   : > { %v414_v21 = vmul.f32 %v1304_v60, %v289_v37  ;;  %v1913_v13 = vmax.f32 %v1417_v24, 0.0  ;;  %v432_v26 = vrot.slane %v400_v11, 1  ;;  %v433_v27 = vrot.slane %v401_v14, 1 }
  0x33   : > { %v435_v15 = vrot.slane %v402_v17, 1  ;;  %v436_v28 = vrot.slane %v403_v19, 1  ;;  %v438_v29 = vrot.slane %v404_v30, 1  ;;  %v439_v31 = vrot.slane %v405_v35, 1 }
  0x34   : > { %v415_v25 = vmul.f32 %v1304_v60, %v1913_v13  ;;  %v441_v18 = vrot.slane %v406_v47, 1  ;;  %v442_v32 = vrot.slane %v407_v48, 1  ;;  %v444_v33 = vrot.slane %v408_v12, 1  ;;  %v1178_v60 = vld [vmem:[%s1374_s27 + $0xf0] sm:$0xff] }
  0x35   : > { %v434_v22 = vsel %vm341_vm1, %v432_v26, %v433_v27  ;;  %v437_v23 = vsel %vm341_vm1, %v435_v15, %v436_v28  ;;  %v445_v34 = vrot.slane %v409_v4, 1  ;;  %v447_v24 = vrot.slane %v410_v16, 1 }
  0x36   : > { %v440_v36 = vsel %vm341_vm1, %v438_v29, %v439_v31  ;;  %v443_v37 = vsel %vm341_vm1, %v441_v18, %v442_v32  ;;  %v448_v49 = vrot.slane %v411_v6, 1  ;;  %v450_v50 = vrot.slane %v412_v20, 1  ;;  %v1306_v6 = vld [vmem:[%s1907_s1 + $0x9] ss:$0 sm:$0xff] }
  0x37   : > { %v446_v52 = vsel %vm341_vm1, %v444_v33, %v445_v34  ;;  %v451_v53 = vrot.slane %v413_v9, 1  ;;  %v453_v54 = vrot.slane %v414_v21, 1  ;;  %v454_v55 = vrot.slane %v415_v25, 1 }
  0x38   : > { %v449_v58 = vsel %vm341_vm1, %v447_v24, %v448_v49  ;;  %v464_v59 = vadd.f32 %v434_v22, %v391_v44  ;;  %v465_v0 = vadd.f32 %v437_v23, %v392_v45  ;;  %v466_v1 = vadd.f32 %v440_v36, %v393_v46  ;;  %v1181_v24 = vld [vmem:[%s1374_s27 + $0x120] sm:$0xff]  ;;  %v1183_v36 = vld [vmem:[%s1374_s27 + $0x130] sm:$0xff]  ;;  %v1184_v49 = vld [vmem:[%s1374_s27 + $0x138] sm:$0x1] }
  0x39   : > { %v452_v61 = vsel %vm341_vm1, %v450_v50, %v451_v53  ;;  %v455_v39 = vsel %vm341_vm1, %v453_v54, %v454_v55  ;;  %v467_v40 = vadd.f32 %v443_v37, %v394_v62  ;;  %v468_v41 = vadd.f32 %v446_v52, %v395_v5  ;;  %v1182_v37 = vld [vmem:[%s1374_s27 + $0x128] sm:$0x1]  ;;  %v1185_v50 = vld [vmem:[%s1374_s27 + $0x140] sm:$0xff]  ;;  %v1188_v55 = vld [vmem:[%s1374_s27 + $0x158] sm:$0x1] }
  0x3a   : > { %v469_v11 = vadd.f32 %v449_v58, %v396_v7  ;;  %v470_v14 = vadd.f32 %v452_v61, %v397_v8  ;;  %v471_v44 = vadd.f32 %v455_v39, %v398_v10  ;;  %v482_v45 = vmax.f32 %v1172_v51, 0.0  ;;  %v1187_v51 = vld [vmem:[%s1374_s27 + $0x150] sm:$0xff]  ;;  %v1186_v54 = vld [vmem:[%s1374_s27 + $0x148] sm:$0x1] }
  0x3b   : > { %v483_v46 = vmax.f32 %v1173_v56, 0.0  ;;  %v484_v17 = vmax.f32 %v1174_v57, 0.0  ;;  %v485_v19 = vmax.f32 %v1175_v63, 0.0  ;;  %v486_v30 = vmax.f32 %v1176_v2, 0.0  ;;  %v1189_v56 = vld [vmem:[%s1374_s27 + $0x160] sm:$0xff]  ;;  %v1191_v57 = vld [vmem:[%s1374_s27 + $0x170] sm:$0xff] }
  0x3c   : > { %v487_v35 = vmax.f32 %v1177_v3, 0.0  ;;  %v488_v47 = vmax.f32 %v1178_v60, 0.0  ;;  %v489_v48 = vmax.f32 %v1179_v38, 0.0  ;;  %v490_v12 = vmax.f32 %v1180_v42, 0.0  ;;  %v1307_v3 = vld [vmem:[%s1907_s1 + $0x4] ss:$0 sm:$0xff] }
  0x3d   : > { %v492_v62 = vmul.f32 %v1305_v43, %v482_v45  ;;  %v493_v5 = vmul.f32 %v1305_v43, %v483_v46  ;;  %v494_v4 = vmul.f32 %v1305_v43, %v484_v17  ;;  %v495_v16 = vmul.f32 %v1305_v43, %v485_v19  ;;  %v1192_v38 = vld [vmem:[%s1374_s27 + $0x178] sm:$0x1]  ;;  %v1194_v42 = vld [vmem:[%s1374_s27 + $0x188] sm:$0x1] }
  0x3e   : > { %v496_v7 = vmul.f32 %v1305_v43, %v486_v30  ;;  %v497_v8 = vmul.f32 %v1305_v43, %v487_v35  ;;  %v498_v10 = vmul.f32 %v1305_v43, %v488_v47  ;;  %v499_v20 = vmul.f32 %v1305_v43, %v489_v48  ;;  %v1196_v43 = vld [vmem:[%s1374_s27 + $0x198] sm:$0x1] }
  0x3f   : > { %v500_v9 = vadd.f32 %v492_v62, %v464_v59  ;;  %v501_v21 = vadd.f32 %v493_v5, %v465_v0  ;;  %v502_v13 = vadd.f32 %v494_v4, %v466_v1  ;;  %v503_v25 = vadd.f32 %v495_v16, %v467_v40  ;;  %v1193_v59 = vld [vmem:[%s1374_s27 + $0x180] sm:$0xff]  ;;  %v1195_v0 = vld [vmem:[%s1374_s27 + $0x190] sm:$0xff] }
  0x40   : > { %v504_v26 = vadd.f32 %v496_v7, %v468_v41  ;;  %v505_v27 = vadd.f32 %v497_v8, %v469_v11  ;;  %v506_v15 = vadd.f32 %v498_v10, %v470_v14  ;;  %v507_v28 = vadd.f32 %v499_v20, %v471_v44  ;;  %v1190_v41 = vld [vmem:[%s1374_s27 + $0x168] sm:$0x1]  ;;  %v1308_v62 = vld [vmem:[%s1907_s1 + $0x6] ss:$0 sm:$0xff] }
  0x41   : > { %v509_v29 = vmul.f32 %v1306_v6, %v483_v46  ;;  %v510_v31 = vmul.f32 %v1306_v6, %v484_v17  ;;  %v511_v18 = vmul.f32 %v1306_v6, %v485_v19  ;;  %v512_v32 = vmul.f32 %v1306_v6, %v486_v30 }
  0x42   : > { %v513_v33 = vmul.f32 %v1306_v6, %v487_v35  ;;  %v514_v22 = vmul.f32 %v1306_v6, %v488_v47  ;;  %v515_v23 = vmul.f32 %v1306_v6, %v489_v48  ;;  %v516_v34 = vmul.f32 %v1306_v6, %v490_v12 }
  0x43   : > { %v517_v52 = vadd.f32 %v509_v29, %v500_v9  ;;  %v518_v53 = vadd.f32 %v510_v31, %v501_v21  ;;  %v519_v63 = vadd.f32 %v511_v18, %v502_v13  ;;  %v520_v58 = vadd.f32 %v512_v32, %v503_v25 }
  0x44   : > { %v542_v1 = vmax.f32 %v1181_v24, 0.0  ;;  %v544_v2 = vmax.f32 %v1183_v36, 0.0  ;;  %v521_v60 = vadd.f32 %v513_v33, %v504_v26  ;;  %v1556_v61 = vadd.f32 %v514_v22, %v505_v27 }
  0x45   : > { %v1558_v39 = vadd.f32 %v515_v23, %v506_v15  ;;  %v1560_v40 = vadd.f32 %v516_v34, %v507_v28  ;;  %v546_v11 = vmax.f32 %v1185_v50, 0.0  ;;  %v548_v14 = vmax.f32 %v1187_v51, 0.0 }
  0x46   : > { %v550_v44 = vmax.f32 %v1189_v56, 0.0  ;;  %v552_v45 = vmax.f32 %v1191_v57, 0.0  ;;  %v543_v46 = vmax.f32 %v1182_v37, 0.0  ;;  %v545_v17 = vmax.f32 %v1184_v49, 0.0 }
  0x47   : > { %v554_v19 = vmax.f32 %v1193_v59, 0.0  ;;  %v556_v30 = vmax.f32 %v1195_v0, 0.0  ;;  %v547_v35 = vmax.f32 %v1186_v54, 0.0  ;;  %v549_v47 = vmax.f32 %v1188_v55, 0.0 }
  0x48   : > { %v559_v48 = vmul.f32 %v1307_v3, %v542_v1  ;;  %v560_v12 = vmul.f32 %v1307_v3, %v544_v2  ;;  %v551_v5 = vmax.f32 %v1190_v41, 0.0  ;;  %v553_v4 = vmax.f32 %v1192_v38, 0.0 }
  0x49   : > { %v555_v16 = vmax.f32 %v1194_v42, 0.0  ;;  %v557_v6 = vmax.f32 %v1196_v43, 0.0  ;;  %v561_v7 = vmul.f32 %v1307_v3, %v546_v11  ;;  %v562_v8 = vmul.f32 %v1307_v3, %v548_v14 }
  0x4a   : > { %v563_v10 = vmul.f32 %v1307_v3, %v550_v44  ;;  %v564_v20 = vmul.f32 %v1307_v3, %v552_v45  ;;  %v565_v9 = vmul.f32 %v1307_v3, %v554_v19  ;;  %v1569_v21 = vmul.f32 %v1307_v3, %v556_v30 }
  0x4b   : > { %v567_v13 = vadd.f32 %v559_v48, %v517_v52  ;;  %v568_v25 = vadd.f32 %v560_v12, %v518_v53  ;;  %v576_v26 = vmul.f32 %v1308_v62, %v542_v1  ;;  %v577_v27 = vmul.f32 %v1308_v62, %v543_v46 }
  0x4c   : > { %v578_v15 = vmul.f32 %v1308_v62, %v544_v2  ;;  %v579_v28 = vmul.f32 %v1308_v62, %v545_v17  ;;  %v580_v29 = vmul.f32 %v1308_v62, %v546_v11  ;;  %v581_v31 = vmul.f32 %v1308_v62, %v547_v35  ;;  %v1201_v35 = vld [vmem:[%s1374_s27 + $0x1f0] sm:$0xff] }
  0x4d   : > { %v582_v18 = vmul.f32 %v1308_v62, %v548_v14  ;;  %v583_v32 = vmul.f32 %v1308_v62, %v549_v47  ;;  %v569_v33 = vadd.f32 %v561_v7, %v519_v63  ;;  %v570_v22 = vadd.f32 %v562_v8, %v520_v58  ;;  %v1197_v14 = vld [vmem:[%s1374_s27 + $0x1b0] sm:$0xff] }
  0x4e   : > { %v584_v23 = vmul.f32 %v1308_v62, %v550_v44  ;;  %v585_v34 = vmul.f32 %v1308_v62, %v551_v5  ;;  %v586_v24 = vmul.f32 %v1308_v62, %v552_v45  ;;  %v587_v36 = vmul.f32 %v1308_v62, %v553_v4  ;;  %v1198_v44 = vld [vmem:[%s1374_s27 + $0x1c0] sm:$0xff]  ;;  %v1203_v4 = vld [vmem:[%s1374_s27 + $0x210] sm:$0xff] }
  0x4f   : > { %v588_v37 = vmul.f32 %v1308_v62, %v554_v19  ;;  %v589_v49 = vmul.f32 %v1308_v62, %v555_v16  ;;  %v608_v50 = vrot.slane %v576_v26, 1  ;;  %v609_v51 = vrot.slane %v577_v27, 1  ;;  %v1199_v19 = vld [vmem:[%s1374_s27 + $0x1d0] sm:$0xff]  ;;  %v1202_v5 = vld [vmem:[%s1374_s27 + $0x200] sm:$0xff] }
  0x50   : > { %v611_v52 = vrot.slane %v578_v15, 1  ;;  %v612_v53 = vrot.slane %v579_v28, 1  ;;  %v614_v54 = vrot.slane %v580_v29, 1  ;;  %v615_v55 = vrot.slane %v581_v31, 1  ;;  %v1204_v27 = vld [vmem:[%s1374_s27 + $0x220] sm:$0xff] }
  0x51   : > { %v617_v56 = vrot.slane %v582_v18, 1  ;;  %v618_v57 = vrot.slane %v583_v32, 1  ;;  %v590_v59 = vmul.f32 %v1308_v62, %v556_v30  ;;  %v591_v0 = vmul.f32 %v1308_v62, %v557_v6  ;;  %v1200_v30 = vld [vmem:[%s1374_s27 + $0x1e0] sm:$0xff] }
  0x52   : > { %v620_v63 = vrot.slane %v584_v23, 1  ;;  %v621_v58 = vrot.slane %v585_v34, 1  ;;  %v571_v1 = vadd.f32 %v563_v10, %v521_v60  ;;  %v610_v2 = vsel %vm341_vm1, %v608_v50, %v609_v51 }
  0x53   : > { %v623_v3 = vrot.slane %v586_v24, 1  ;;  %v624_v41 = vrot.slane %v587_v36, 1  ;;  %v613_v38 = vsel %vm341_vm1, %v611_v52, %v612_v53  ;;  %v616_v42 = vsel %vm341_vm1, %v614_v54, %v615_v55 }
  0x54   : > { %v626_v43 = vrot.slane %v588_v37, 1  ;;  %v627_v11 = vrot.slane %v589_v49, 1  ;;  %v572_v45 = vadd.f32 %v564_v20, %v1556_v61  ;;  %v573_v46 = vadd.f32 %v565_v9, %v1558_v39  ;;  %v1309_v61 = vld [vmem:[%s1907_s1 + $0x5] ss:$0 sm:$0xff] }
  0x55   : > { %v619_v60 = vsel %vm341_vm1, %v617_v56, %v618_v57  ;;  %v622_v17 = vsel %vm341_vm1, %v620_v63, %v621_v58  ;;  %v625_v47 = vsel %vm341_vm1, %v623_v3, %v624_v41  ;;  %v629_v48 = vrot.slane %v590_v59, 1 }
  0x56   : > { %v630_v12 = vrot.slane %v591_v0, 1  ;;  %v640_v62 = vadd.f32 %v610_v2, %v567_v13  ;;  %v628_v39 = vsel %vm341_vm1, %v626_v43, %v627_v11  ;;  %v641_v16 = vadd.f32 %v613_v38, %v568_v25 }
  0x57   : > { %v642_v6 = vadd.f32 %v616_v42, %v569_v33  ;;  %v657_v7 = vmax.f32 %v1197_v14, 0.0  ;;  %v643_v8 = vadd.f32 %v619_v60, %v570_v22  ;;  %v658_v10 = vmax.f32 %v1198_v44, 0.0 }
  0x58   : > { %v659_v20 = vmax.f32 %v1199_v19, 0.0  ;;  %v660_v9 = vmax.f32 %v1200_v30, 0.0  ;;  %v644_v26 = vadd.f32 %v622_v17, %v571_v1  ;;  %v661_v15 = vmax.f32 %v1201_v35, 0.0 }
  0x59   : > { %v662_v13 = vmax.f32 %v1202_v5, 0.0  ;;  %v663_v28 = vmax.f32 %v1203_v4, 0.0  ;;  %v666_v29 = vmul.f32 %v1309_v61, %v657_v7  ;;  %v667_v31 = vmul.f32 %v1309_v61, %v658_v10 }
  0x5a   : > { %v668_v18 = vmul.f32 %v1309_v61, %v659_v20  ;;  %v669_v32 = vmul.f32 %v1309_v61, %v660_v9  ;;  %v574_v23 = vadd.f32 %v1569_v21, %v1560_v40  ;;  %v631_v25 = vsel %vm341_vm1, %v629_v48, %v630_v12 }
  0x5b   : > { %v670_v33 = vmul.f32 %v1309_v61, %v661_v15  ;;  %v645_v22 = vadd.f32 %v625_v47, %v572_v45  ;;  %v664_v34 = vmax.f32 %v1204_v27, 0.0  ;;  %v674_v24 = vadd.f32 %v666_v29, %v640_v62 }
  0x5c   : > { %v675_v36 = vadd.f32 %v667_v31, %v641_v16  ;;  %v646_v37 = vadd.f32 %v628_v39, %v573_v46  ;;  %v671_v49 = vmul.f32 %v1309_v61, %v662_v13  ;;  %v676_v50 = vadd.f32 %v668_v18, %v642_v6 }
  0x5d   : > { %v677_v51 = vadd.f32 %v669_v32, %v643_v8  ;;  %v672_v52 = vmul.f32 %v1309_v61, %v663_v28  ;;  %v678_v53 = vadd.f32 %v670_v33, %v644_v26  ;;  %vm683_vm2 = vcmask 719872  }
  0x5e   : > { %v709_v54 = vmul.f32 %v674_v24, %v674_v24  ;;  %v684_v55 = vsel %vm683_vm2, %v674_v24, 0.0  ;;  %v685_v56 = vsel %vm683_vm2, %v675_v36, 0.0  ;;  %v687_v40 = vsel %vm683_vm2, %v676_v50, 0.0  ;;  %743 = vst.msk [vmem:[%s742_s25] sm:$0xff] %vm683_vm2, %v674_v24  ;;  %v708_v24 = vld [vmem:[#allocation4] sm:$0x1] }
  0x5f   : > { %v710_v21 = vmul.f32 %v675_v36, %v675_v36  ;;  %v647_v57 = vadd.f32 %v631_v25, %v574_v23  ;;  %v673_v59 = vmul.f32 %v1309_v61, %v664_v34  ;;  %v686_v0 = vadd.f32 %v685_v56, %v684_v55  ;;  %744 = vst.msk [vmem:[%s742_s25 + $0x8] sm:$0xff] %vm683_vm2, %v675_v36  ;;  %v682_v23 = vld [vmem:[#allocation3] sm:$0x1] }
  0x60   : > { %v679_v63 = vadd.f32 %v671_v49, %v645_v22  ;;  %v689_v58 = vsel %vm683_vm2, %v677_v51, 0.0  ;;  %v711_v1 = vmul.f32 %v676_v50, %v676_v50  ;;  %v712_v2 = vmul.f32 %v677_v51, %v677_v51  ;;  %745 = vst.msk [vmem:[%s742_s25 + $0x10] sm:$0xff] %vm683_vm2, %v676_v50 }
  0x61   : > { %v680_v3 = vadd.f32 %v672_v52, %v646_v37  ;;  %v688_v41 = vadd.f32 %v687_v40, %v686_v0  ;;  %v691_v38 = vsel %vm683_vm2, %v678_v53, 0.0  ;;  %746 = vst.msk [vmem:[%s742_s25 + $0x18] sm:$0xff] %vm683_vm2, %v677_v51  ;;  %v713_v42 = vmul.f32 %v678_v53, %v678_v53 }
  0x62   : > { %v717_v43 = vsel %vm683_vm2, %v709_v54, 0.0  ;;  %v718_v11 = vsel %vm683_vm2, %v710_v21, 0.0  ;;  %v720_v14 = vsel %vm683_vm2, %v711_v1, 0.0  ;;  %747 = vst.msk [vmem:[%s742_s25 + $0x20] sm:$0xff] %vm683_vm2, %v678_v53  ;;  %v681_v44 = vadd.f32 %v673_v59, %v647_v57 }
  0x63   : > { %v690_v45 = vadd.f32 %v689_v58, %v688_v41  ;;  %v719_v46 = vadd.f32 %v718_v11, %v717_v43  ;;  %748 = vst.msk [vmem:[%s742_s25 + $0x28] sm:$0xff] %vm683_vm2, %v679_v63  ;;  %v693_v60 = vsel %vm683_vm2, %v679_v63, 0.0  ;;  %v714_v17 = vmul.f32 %v679_v63, %v679_v63 }
  0x64   : > { %v722_v19 = vsel %vm683_vm2, %v712_v2, 0.0  ;;  %749 = vst.msk [vmem:[%s742_s25 + $0x30] sm:$0xff] %vm683_vm2, %v680_v3  ;;  %v695_v47 = vsel %vm683_vm2, %v680_v3, 0.0  ;;  %v715_v48 = vmul.f32 %v680_v3, %v680_v3  ;;  %v724_v12 = vsel %vm683_vm2, %v713_v42, 0.0 }
  0x65   : > { %v692_v30 = vadd.f32 %v691_v38, %v690_v45  ;;  %v721_v35 = vadd.f32 %v720_v14, %v719_v46  ;;  %750 = vst.msk [vmem:[%s742_s25 + $0x38] sm:$0xff] %vm683_vm2, %v681_v44  ;;  %v697_v4 = vsel %vm683_vm2, %v681_v44, 0.0  ;;  %v716_v61 = vmul.f32 %v681_v44, %v681_v44 }
  0x66   : > { %v726_v39 = vsel %vm683_vm2, %v714_v17, 0.0  ;;  %v728_v7 = vsel %vm683_vm2, %v715_v48, 0.0  ;;  %vm706_vm3 = vcmask 712704  }
  0x67   : > { %v694_v62 = vadd.f32 %v693_v60, %v692_v30  ;;  %v723_v5 = vadd.f32 %v722_v19, %v721_v35  ;;  %v730_v20 = vsel %vm683_vm2, %v716_v61, 0.0 }
  0x69   : > { %v696_v16 = vadd.f32 %v695_v47, %v694_v62  ;;  %v725_v6 = vadd.f32 %v724_v12, %v723_v5 }
  0x6b   : > { %v698_v8 = vadd.f32 %v697_v4, %v696_v16  ;;  %v727_v10 = vadd.f32 %v726_v39, %v725_v6 }
  0x6d   : > { %v699_v9 = vrot.slane %v698_v8, 4  ;;  %v729_v26 = vadd.f32 %v728_v7, %v727_v10 }
  0x6f   : > { %v700_v27 = vadd.f32 %v699_v9, %v698_v8  ;;  %v731_v15 = vadd.f32 %v730_v20, %v729_v26 }
  0x71   : > { %v701_v13 = vrot.slane %v700_v27, 2  ;;  %v732_v28 = vrot.slane %v731_v15, 4 }
  0x73   : > { %v702_v29 = vadd.f32 %v701_v13, %v700_v27  ;;  %v733_v31 = vadd.f32 %v732_v28, %v731_v15 }
  0x75   : > { %v703_v18 = vrot.slane %v702_v29, 1  ;;  %v734_v32 = vrot.slane %v733_v31, 2 }
  0x77   : > { %v704_v25 = vadd.f32 %v703_v18, %v702_v29  ;;  %v735_v33 = vadd.f32 %v734_v32, %v733_v31 }
  0x79   : > { %v705_v22 = vadd.f32 %v704_v25, %v682_v23  ;;  %v736_v34 = vrot.slane %v735_v33, 1 }
  0x7b   : > { %707 = vst.msk [vmem:[#allocation3] sm:$0x1] %vm706_vm3, %v705_v22  ;;  %v737_v36 = vadd.f32 %v736_v34, %v735_v33  ;;  %754 = sbr.rel (%p1207_p5) target bundleno = 510 (0x1fe), region = 52 }
  0x7d   : > { %v738_v37 = vadd.f32 %v737_v36, %v708_v24 }
  0x7f   : > { %739 = vst.msk [vmem:[#allocation4] sm:$0x1] %vm706_vm3, %v738_v37 }
  0x80   : > { %v761_v0 = vld [vmem:[%s1908_s2] sm:$0x1]  ;;  %v789_v2 = vld [vmem:[%s1909_s3 + $0x78] sm:$0xff]  ;;  %v788_v41 = vld [vmem:[%s1909_s3 + $0x70] sm:$0xff] }
  0x81   : > { %v787_v43 = vld [vmem:[%s1909_s3 + $0x68] sm:$0xff]  ;;  %v786_v14 = vld [vmem:[%s1909_s3 + $0x60] sm:$0xff]  ;;  %v785_v45 = vld [vmem:[%s1909_s3 + $0x58] sm:$0xff] }
  0x82   : > { %v755_v49 = vld [vmem:[#allocation3] sm:$0x1]  ;;  %v784_v60 = vld [vmem:[%s1909_s3 + $0x50] sm:$0xff]  ;;  %v783_v19 = vld [vmem:[%s1909_s3 + $0x48] sm:$0xff] }
  0x83   : > { %v756_v51 = vmul.f32 0.0078125, %v755_v49  ;;  %v782_v35 = vld [vmem:[%s1909_s3 + $0x40] sm:$0xff]  ;;  %v781_v48 = vld [vmem:[%s1909_s3 + $0x38] sm:$0xff]  ;;  %v780_v62 = vld [vmem:[%s1909_s3 + $0x30] sm:$0xff] }
  0x84   : > { %v779_v4 = vld [vmem:[%s1909_s3 + $0x28] sm:$0xff]  ;;  %v778_v39 = vld [vmem:[%s1909_s3 + $0x20] sm:$0xff]  ;;  %v777_v6 = vld [vmem:[%s1909_s3 + $0x18] sm:$0xff] }
  0x85   : > { %v759_v53 = vmul.f32 %v756_v51, %v756_v51  ;;  %v776_v8 = vld [vmem:[%s1909_s3 + $0x10] sm:$0xff]  ;;  %v775_v20 = vld [vmem:[%s1909_s3 + $0x8] sm:$0xff]  ;;  %v774_v26 = vld [vmem:[%s1909_s3] sm:$0xff] }
  0x86   : > { %v757_v50 = vld [vmem:[#allocation4] sm:$0x1]  ;;  %v810_v31 = vld [vmem:[#allocation2 + $0x8] sm:$0xff]  ;;  %v811_v25 = vld [vmem:[#allocation2 + $0x10] sm:$0xff] }
  0x87   : > { %v758_v52 = vmul.f32 0.0078125, %v757_v50  ;;  %v809_v15 = vld [vmem:[#allocation2] sm:$0xff]  ;;  %v814_v18 = vld [vmem:[#allocation2 + $0x28] sm:$0xff]  ;;  %v815_v33 = vld [vmem:[#allocation2 + $0x30] sm:$0xff] }
  0x88   : > { %v813_v13 = vld [vmem:[#allocation2 + $0x20] sm:$0xff]  ;;  %v818_v32 = vld [vmem:[#allocation2 + $0x48] sm:$0xff]  ;;  %v819_v22 = vld [vmem:[#allocation2 + $0x50] sm:$0xff] }
  0x89   : > { %v760_v54 = vsub.f32 %v758_v52, %v759_v53  ;;  %v817_v28 = vld [vmem:[#allocation2 + $0x40] sm:$0xff]  ;;  %v822_v23 = vld [vmem:[#allocation2 + $0x68] sm:$0xff]  ;;  %v823_v34 = vld [vmem:[#allocation2 + $0x70] sm:$0xff] }
  0x8a   : > { %v821_v29 = vld [vmem:[#allocation2 + $0x60] sm:$0xff]  ;;  %v812_v24 = vld [vmem:[#allocation2 + $0x18] sm:$0xff] }
  0x8b   : > { %v762_v55 = vadd.f32 1e-05, %v760_v54  ;;  %v816_v36 = vld [vmem:[#allocation2 + $0x38] sm:$0xff] }
  0x8c   : > { %v820_v37 = vld [vmem:[#allocation2 + $0x58] sm:$0xff] }
  0x8d   : > { %1311 = vrsqrt.f32 %v762_v55  ;;  %vm769_vm4 = vweird.f32 %v762_v55  ;;  %v824_v49 = vld [vmem:[#allocation2 + $0x78] sm:$0xff] }
  0x93   : > { %v1312_v56 = vpop.eup %1311 }
  0x94   : > { %v764_v40 = vmul.f32 %v1312_v56, %v762_v55  ;;  %vm770_vm5 = vweird.f32 %v1312_v56 }
  0x95   : > { %vm771_vm6 = vmor %vm769_vm4, %vm770_vm5 }
  0x96   : > { %v765_v21 = vmul.f32 %v1312_v56, %v764_v40 }
  0x98   : > { %v766_v57 = vmul.f32 0.5, %v765_v21 }
  0x9a   : > { %v767_v59 = vsub.f32 1.5, %v766_v57 }
  0x9c   : > { %v768_v63 = vmul.f32 %v1312_v56, %v767_v59 }
  0x9e   : > { %v772_v58 = vsel %vm771_vm6, %v1312_v56, %v768_v63 }
  0x9f   : > { %v773_v1 = vmul.f32 %v772_v58, %v761_v0 }
  0xa1   : > { %v1626_v3 = vperm.slane %v773_v1, 0 }
  0xa3   : > { %v808_v38 = vmul.f32 %v1626_v3, %v789_v2  ;;  %v807_v42 = vmul.f32 %v1626_v3, %v788_v41  ;;  %v806_v11 = vmul.f32 %v1626_v3, %v787_v43  ;;  %v805_v44 = vmul.f32 %v1626_v3, %v786_v14 }
  0xa4   : > { %v804_v46 = vmul.f32 %v1626_v3, %v785_v45  ;;  %v803_v17 = vmul.f32 %v1626_v3, %v784_v60  ;;  %v802_v30 = vmul.f32 %v1626_v3, %v783_v19  ;;  %v801_v47 = vmul.f32 %v1626_v3, %v782_v35 }
  0xa5   : > { %1208 = vmatpush.xpose.msk.msra.mxu0 %vm683_vm2, %v808_v38  ;;  %1243 = vmatpush.xpose.msk.msra.mxu1 %vm683_vm2, %v808_v38  ;;  %v800_v12 = vmul.f32 %v1626_v3, %v781_v48  ;;  %v799_v5 = vmul.f32 %v1626_v3, %v780_v62  ;;  %v798_v61 = vmul.f32 %v1626_v3, %v779_v4 }
  0xa6   : > { %1244 = vmatpush.xpose.msk.msra.mxu2 %vm683_vm2, %v808_v38  ;;  %1245 = vmatpush.xpose.msk.msra.mxu3 %vm683_vm2, %v808_v38  ;;  %v797_v16 = vmul.f32 %v1626_v3, %v778_v39  ;;  %v796_v7 = vmul.f32 %v1626_v3, %v777_v6  ;;  %v795_v10 = vmul.f32 %v1626_v3, %v776_v8 }
  0xa7   : > { %v794_v9 = vmul.f32 %v1626_v3, %v775_v20  ;;  %v793_v27 = vmul.f32 %v1626_v3, %v774_v26 }
  0xa9   : > { %1209 = vmatpush.xpose.msk.msra.mxu0 %vm683_vm2, %v807_v42  ;;  %1246 = vmatpush.xpose.msk.msra.mxu1 %vm683_vm2, %v807_v42 }
  0xaa   : > { %1247 = vmatpush.xpose.msk.msra.mxu2 %vm683_vm2, %v807_v42  ;;  %1248 = vmatpush.xpose.msk.msra.mxu3 %vm683_vm2, %v807_v42 }
  0xad   : > { %1210 = vmatpush.xpose.msk.msra.mxu0 %vm683_vm2, %v806_v11  ;;  %1249 = vmatpush.xpose.msk.msra.mxu1 %vm683_vm2, %v806_v11 }
  0xae   : > { %1250 = vmatpush.xpose.msk.msra.mxu2 %vm683_vm2, %v806_v11  ;;  %1251 = vmatpush.xpose.msk.msra.mxu3 %vm683_vm2, %v806_v11 }
  0xb1   : > { %1211 = vmatpush.xpose.msk.msra.mxu0 %vm683_vm2, %v805_v44  ;;  %1252 = vmatpush.xpose.msk.msra.mxu1 %vm683_vm2, %v805_v44 }
  0xb2   : > { %1253 = vmatpush.xpose.msk.msra.mxu2 %vm683_vm2, %v805_v44  ;;  %1254 = vmatpush.xpose.msk.msra.mxu3 %vm683_vm2, %v805_v44 }
  0xb5   : > { %1212 = vmatpush.xpose.msk.msra.mxu0 %vm683_vm2, %v804_v46  ;;  %1255 = vmatpush.xpose.msk.msra.mxu1 %vm683_vm2, %v804_v46 }
  0xb6   : > { %1256 = vmatpush.xpose.msk.msra.mxu2 %vm683_vm2, %v804_v46  ;;  %1257 = vmatpush.xpose.msk.msra.mxu3 %vm683_vm2, %v804_v46 }
  0xb9   : > { %1213 = vmatpush.xpose.msk.msra.mxu0 %vm683_vm2, %v803_v17  ;;  %1258 = vmatpush.xpose.msk.msra.mxu1 %vm683_vm2, %v803_v17 }
  0xba   : > { %1259 = vmatpush.xpose.msk.msra.mxu2 %vm683_vm2, %v803_v17  ;;  %1260 = vmatpush.xpose.msk.msra.mxu3 %vm683_vm2, %v803_v17 }
  0xbd   : > { %1214 = vmatpush.xpose.msk.msra.mxu0 %vm683_vm2, %v802_v30  ;;  %1261 = vmatpush.xpose.msk.msra.mxu1 %vm683_vm2, %v802_v30 }
  0xbe   : > { %1262 = vmatpush.xpose.msk.msra.mxu2 %vm683_vm2, %v802_v30  ;;  %1263 = vmatpush.xpose.msk.msra.mxu3 %vm683_vm2, %v802_v30 }
  0xc1   : > { %1215 = vmatpush.xpose.msk.msra.mxu0 %vm683_vm2, %v801_v47  ;;  %1264 = vmatpush.xpose.msk.msra.mxu1 %vm683_vm2, %v801_v47 }
  0xc2   : > { %1265 = vmatpush.xpose.msk.msra.mxu2 %vm683_vm2, %v801_v47  ;;  %1266 = vmatpush.xpose.msk.msra.mxu3 %vm683_vm2, %v801_v47 }
  0xc5   : > { %1216 = vmatpush.xpose.msk.msra.mxu0 %vm683_vm2, %v800_v12  ;;  %1267 = vmatpush.xpose.msk.msra.mxu1 %vm683_vm2, %v800_v12 }
  0xc6   : > { %1268 = vmatpush.xpose.msk.msra.mxu2 %vm683_vm2, %v800_v12  ;;  %1269 = vmatpush.xpose.msk.msra.mxu3 %vm683_vm2, %v800_v12 }
  0xc9   : > { %1217 = vmatpush.xpose.msk.msra.mxu0 %vm683_vm2, %v799_v5  ;;  %1270 = vmatpush.xpose.msk.msra.mxu1 %vm683_vm2, %v799_v5 }
  0xca   : > { %1271 = vmatpush.xpose.msk.msra.mxu2 %vm683_vm2, %v799_v5  ;;  %1272 = vmatpush.xpose.msk.msra.mxu3 %vm683_vm2, %v799_v5 }
  0xcd   : > { %1218 = vmatpush.xpose.msk.msra.mxu0 %vm683_vm2, %v798_v61  ;;  %1273 = vmatpush.xpose.msk.msra.mxu1 %vm683_vm2, %v798_v61 }
  0xce   : > { %1274 = vmatpush.xpose.msk.msra.mxu2 %vm683_vm2, %v798_v61  ;;  %1275 = vmatpush.xpose.msk.msra.mxu3 %vm683_vm2, %v798_v61 }
  0xd1   : > { %1219 = vmatpush.xpose.msk.msra.mxu0 %vm683_vm2, %v797_v16  ;;  %1276 = vmatpush.xpose.msk.msra.mxu1 %vm683_vm2, %v797_v16 }
  0xd2   : > { %1277 = vmatpush.xpose.msk.msra.mxu2 %vm683_vm2, %v797_v16  ;;  %1278 = vmatpush.xpose.msk.msra.mxu3 %vm683_vm2, %v797_v16 }
  0xd5   : > { %1220 = vmatpush.xpose.msk.msra.mxu0 %vm683_vm2, %v796_v7  ;;  %1279 = vmatpush.xpose.msk.msra.mxu1 %vm683_vm2, %v796_v7 }
  0xd6   : > { %1280 = vmatpush.xpose.msk.msra.mxu2 %vm683_vm2, %v796_v7  ;;  %1281 = vmatpush.xpose.msk.msra.mxu3 %vm683_vm2, %v796_v7 }
  0xd9   : > { %1221 = vmatpush.xpose.msk.msra.mxu0 %vm683_vm2, %v795_v10  ;;  %1282 = vmatpush.xpose.msk.msra.mxu1 %vm683_vm2, %v795_v10 }
  0xda   : > { %1283 = vmatpush.xpose.msk.msra.mxu2 %vm683_vm2, %v795_v10  ;;  %1284 = vmatpush.xpose.msk.msra.mxu3 %vm683_vm2, %v795_v10 }
  0xdd   : > { %1222 = vmatpush.xpose.msk.msra.mxu0 %vm683_vm2, %v794_v9  ;;  %1285 = vmatpush.xpose.msk.msra.mxu1 %vm683_vm2, %v794_v9 }
  0xde   : > { %1286 = vmatpush.xpose.msk.msra.mxu2 %vm683_vm2, %v794_v9  ;;  %1287 = vmatpush.xpose.msk.msra.mxu3 %vm683_vm2, %v794_v9 }
  0xe1   : > { %1223 = vmatpush.xpose.msk.msra.mxu0 %vm683_vm2, %v793_v27  ;;  %1288 = vmatpush.xpose.msk.msra.mxu1 %vm683_vm2, %v793_v27 }
  0xe2   : > { %1289 = vmatpush.xpose.msk.msra.mxu2 %vm683_vm2, %v793_v27  ;;  %1290 = vmatpush.xpose.msk.msra.mxu3 %vm683_vm2, %v793_v27 }
  0xe4   : > { %1224 = vmatmul.msk.f32.vlgmr.msra.gmra.mxu0 %vm683_vm2, %v809_v15  ;;  %1228 = vmatmul.msk.f32.vlgmr.msra.gmra.mxu1 %vm683_vm2, %v813_v13 }
  0xe5   : > { %1232 = vmatmul.msk.f32.vlgmr.msra.gmra.mxu2 %vm683_vm2, %v817_v28  ;;  %1236 = vmatmul.msk.f32.vlgmr.msra.gmra.mxu3 %vm683_vm2, %v821_v29 }
  0xec   : > { %1225 = vmatmul.msk.f32.gmra.mxu0 %vm683_vm2, %v810_v31  ;;  %1229 = vmatmul.msk.f32.gmra.mxu1 %vm683_vm2, %v814_v18 }
  0xed   : > { %1233 = vmatmul.msk.f32.gmra.mxu2 %vm683_vm2, %v818_v32  ;;  %1237 = vmatmul.msk.f32.gmra.mxu3 %vm683_vm2, %v822_v23 }
  0xf4   : > { %1226 = vmatmul.msk.f32.gmra.mxu0 %vm683_vm2, %v811_v25  ;;  %1230 = vmatmul.msk.f32.gmra.mxu1 %vm683_vm2, %v815_v33 }
  0xf5   : > { %1234 = vmatmul.msk.f32.gmra.mxu2 %vm683_vm2, %v819_v22  ;;  %1238 = vmatmul.msk.f32.gmra.mxu3 %vm683_vm2, %v823_v34 }
  0xfc   : > { %1227 = vmatmul.msk.f32.gmra.mxu0 %vm683_vm2, %v812_v24  ;;  %1231 = vmatmul.msk.f32.gmra.mxu1 %vm683_vm2, %v816_v36 }
  0xfd   : > { %1235 = vmatmul.msk.f32.gmra.mxu2 %vm683_vm2, %v820_v37  ;;  %1239 = vmatmul.msk.f32.gmra.mxu3 %vm683_vm2, %v824_v49 }
 0x161   : > { %v938_v50 = vpop.f32.mrf.mxu0  ;;  %v950_v51 = vpop.f32.mrf.mxu1 }
 0x168   : > { %v962_v53 = vpop.f32.mrf.mxu2  ;;  %v974_v56 = vpop.f32.mrf.mxu3 }
 0x169   : > { %v941_v52 = vpop.f32.mrf.mxu0  ;;  %v953_v54 = vpop.f32.mrf.mxu1 }
 0x16a   : > { %v986_v57 = vadd.f32 %v941_v52, %v938_v50 }
 0x170   : > { %v965_v40 = vpop.f32.mrf.mxu2  ;;  %v977_v58 = vpop.f32.mrf.mxu3 }
 0x171   : > { %v944_v55 = vpop.f32.mrf.mxu0  ;;  %v956_v21 = vpop.f32.mrf.mxu1 }
 0x172   : > { %v987_v59 = vadd.f32 %v986_v57, %v944_v55 }
 0x178   : > { %v968_v2 = vpop.f32.mrf.mxu2  ;;  %v980_v11 = vpop.f32.mrf.mxu3 }
 0x179   : > { %v947_v0 = vpop.f32.mrf.mxu0  ;;  %v959_v41 = vpop.f32.mrf.mxu1 }
 0x17a   : > { %v988_v63 = vadd.f32 %v987_v59, %v947_v0 }
 0x17c   : > { %v989_v1 = vadd.f32 %v988_v63, %v950_v51 }
 0x17e   : > { %v990_v3 = vadd.f32 %v989_v1, %v953_v54 }
 0x180   : > { %v991_v38 = vadd.f32 %v990_v3, %v956_v21  ;;  %v971_v44 = vpop.f32.mrf.mxu2  ;;  %v983_v19 = vpop.f32.mrf.mxu3 }
 0x182   : > { %v992_v42 = vadd.f32 %v991_v38, %v959_v41 }
 0x184   : > { %v993_v43 = vadd.f32 %v992_v42, %v962_v53 }
 0x186   : > { %v994_v14 = vadd.f32 %v993_v43, %v965_v40 }
 0x188   : > { %v995_v45 = vadd.f32 %v994_v14, %v968_v2 }
 0x18a   : > { %v996_v46 = vadd.f32 %v995_v45, %v971_v44 }
 0x18c   : > { %v997_v60 = vadd.f32 %v996_v46, %v974_v56 }
 0x18e   : > { %v998_v17 = vadd.f32 %v997_v60, %v977_v58 }
 0x190   : > { %v999_v30 = vadd.f32 %v998_v17, %v980_v11 }
 0x192   : > { %v1000_v35 = vadd.f32 %v999_v30, %v983_v19 }
 0x194   : > { %v1001_v47 = vrot.slane %v1000_v35, 4 }
 0x196   : > { %v1002_v48 = vadd.f32 %v1001_v47, %v1000_v35 }
 0x198   : > { %v1003_v12 = vrot.slane %v1002_v48, 2 }
 0x19a   : > { %v1004_v62 = vadd.f32 %v1003_v12, %v1002_v48 }
 0x19c   : > { %v1005_v5 = vrot.slane %v1004_v62, 1 }
 0x19e   : > { %v1006_v4 = vadd.f32 %v1005_v5, %v1004_v62  ;;  %v1062_v62 = vld [vmem:[%s1910_s4] sm:$0x1] }
 0x1a0   : > { %v1007_v61 = vmul.f32 0.0078125, %v1006_v4 }
 0x1a2   : > { %v1769_v39 = vsub.f32 %v938_v50, %v1007_v61  ;;  %v1771_v16 = vsub.f32 %v941_v52, %v1007_v61  ;;  %v1773_v6 = vsub.f32 %v944_v55, %v1007_v61  ;;  %v1779_v10 = vsub.f32 %v947_v0, %v1007_v61 }
 0x1a3   : > { %v1781_v20 = vsub.f32 %v950_v51, %v1007_v61  ;;  %v1785_v27 = vsub.f32 %v953_v54, %v1007_v61  ;;  %v1789_v28 = vsub.f32 %v956_v21, %v1007_v61  ;;  %v1793_v18 = vsub.f32 %v959_v41, %v1007_v61 }
 0x1a4   : > { %v1024_v7 = vmul.f32 %v1769_v39, %v1769_v39  ;;  %v1025_v8 = vmul.f32 %v1771_v16, %v1771_v16  ;;  %v1026_v9 = vmul.f32 %v1773_v6, %v1773_v6  ;;  %v1027_v15 = vmul.f32 %v1779_v10, %v1779_v10 }
 0x1a5   : > { %v1028_v29 = vmul.f32 %v1781_v20, %v1781_v20  ;;  %v1029_v32 = vmul.f32 %v1785_v27, %v1785_v27  ;;  %v1797_v25 = vsub.f32 %v962_v53, %v1007_v61  ;;  %v1030_v33 = vmul.f32 %v1789_v28, %v1789_v28 }
 0x1a6   : > { %v1040_v26 = vadd.f32 %v1025_v8, %v1024_v7  ;;  %v1801_v34 = vsub.f32 %v965_v40, %v1007_v61  ;;  %v1031_v24 = vmul.f32 %v1793_v18, %v1793_v18  ;;  %v1805_v37 = vsub.f32 %v968_v2, %v1007_v61 }
 0x1a7   : > { %v1032_v49 = vmul.f32 %v1797_v25, %v1797_v25  ;;  %v1809_v51 = vsub.f32 %v971_v44, %v1007_v61  ;;  %v1813_v54 = vsub.f32 %v974_v56, %v1007_v61  ;;  %v1817_v21 = vsub.f32 %v977_v58, %v1007_v61 }
 0x1a8   : > { %v1041_v13 = vadd.f32 %v1040_v26, %v1026_v9  ;;  %v1033_v52 = vmul.f32 %v1801_v34, %v1801_v34  ;;  %v1034_v55 = vmul.f32 %v1805_v37, %v1805_v37  ;;  %v1821_v0 = vsub.f32 %v980_v11, %v1007_v61 }
 0x1a9   : > { %v1035_v57 = vmul.f32 %v1809_v51, %v1809_v51  ;;  %v1036_v63 = vmul.f32 %v1813_v54, %v1813_v54  ;;  %v1825_v2 = vsub.f32 %v983_v19, %v1007_v61  ;;  %v1037_v56 = vmul.f32 %v1817_v21, %v1817_v21 }
 0x1aa   : > { %v1042_v31 = vadd.f32 %v1041_v13, %v1027_v15  ;;  %v1038_v58 = vmul.f32 %v1821_v0, %v1821_v0  ;;  %v1310_v15 = vld [vmem:[%s1911_s5] ss:$0 sm:$0xff] }
 0x1ab   : > { %v1039_v38 = vmul.f32 %v1825_v2, %v1825_v2 }
 0x1ac   : > { %v1043_v23 = vadd.f32 %v1042_v31, %v1028_v29 }
 0x1ae   : > { %v1044_v22 = vadd.f32 %v1043_v23, %v1029_v32 }
 0x1b0   : > { %v1045_v36 = vadd.f32 %v1044_v22, %v1030_v33 }
 0x1b2   : > { %v1046_v50 = vadd.f32 %v1045_v36, %v1031_v24 }
 0x1b4   : > { %v1047_v53 = vadd.f32 %v1046_v50, %v1032_v49 }
 0x1b6   : > { %v1048_v40 = vadd.f32 %v1047_v53, %v1033_v52 }
 0x1b8   : > { %v1049_v59 = vadd.f32 %v1048_v40, %v1034_v55 }
 0x1ba   : > { %v1050_v1 = vadd.f32 %v1049_v59, %v1035_v57 }
 0x1bc   : > { %v1051_v3 = vadd.f32 %v1050_v1, %v1036_v63 }
 0x1be   : > { %v1052_v41 = vadd.f32 %v1051_v3, %v1037_v56 }
 0x1c0   : > { %v1053_v42 = vadd.f32 %v1052_v41, %v1038_v58 }
 0x1c2   : > { %v1054_v43 = vadd.f32 %v1053_v42, %v1039_v38 }
 0x1c4   : > { %v1055_v11 = vrot.slane %v1054_v43, 4 }
 0x1c6   : > { %v1056_v14 = vadd.f32 %v1055_v11, %v1054_v43 }
 0x1c8   : > { %v1057_v44 = vrot.slane %v1056_v14, 2 }
 0x1ca   : > { %v1058_v45 = vadd.f32 %v1057_v44, %v1056_v14 }
 0x1cc   : > { %v1059_v46 = vrot.slane %v1058_v45, 1 }
 0x1ce   : > { %v1060_v60 = vadd.f32 %v1059_v46, %v1058_v45 }
 0x1d0   : > { %v1061_v17 = vmul.f32 0.0078125, %v1060_v60 }
 0x1d2   : > { %v1063_v19 = vadd.f32 1e-05, %v1061_v17 }
 0x1d4   : > { %1313 = vrsqrt.f32 %v1063_v19  ;;  %vm1070_vm8 = vweird.f32 %v1063_v19 }
 0x1da   : > { %v1314_v30 = vpop.eup %1313 }
 0x1db   : > { %v1065_v35 = vmul.f32 %v1314_v30, %v1063_v19  ;;  %vm1071_vm7 = vweird.f32 %v1314_v30 }
 0x1dc   : > { %vm1072_vm9 = vmor %vm1070_vm8, %vm1071_vm7 }
 0x1dd   : > { %v1066_v47 = vmul.f32 %v1314_v30, %v1065_v35 }
 0x1df   : > { %v1067_v48 = vmul.f32 0.5, %v1066_v47 }
 0x1e1   : > { %v1068_v12 = vsub.f32 1.5, %v1067_v48 }
 0x1e3   : > { %v1069_v5 = vmul.f32 %v1314_v30, %v1068_v12 }
 0x1e5   : > { %v1073_v4 = vsel %vm1072_vm9, %v1314_v30, %v1069_v5 }
 0x1e6   : > { %v1074_v61 = vmul.f32 %v1073_v4, %v1062_v62 }
 0x1e8   : > { %v1076_v7 = vperm.slane %v1074_v61, 0 }
 0x1ea   : > { %v1078_v8 = vmul.f32 %v1076_v7, %v1769_v39  ;;  %v1079_v9 = vmul.f32 %v1076_v7, %v1771_v16  ;;  %v1080_v26 = vmul.f32 %v1076_v7, %v1773_v6  ;;  %v1081_v13 = vmul.f32 %v1076_v7, %v1779_v10 }
 0x1eb   : > { %v1082_v29 = vmul.f32 %v1076_v7, %v1781_v20  ;;  %v1083_v31 = vmul.f32 %v1076_v7, %v1785_v27  ;;  %v1084_v32 = vmul.f32 %v1076_v7, %v1789_v28  ;;  %v1085_v39 = vmul.f32 %v1076_v7, %v1793_v18 }
 0x1ec   : > { %v1098_v23 = vadd.f32 %v1310_v15, %v1078_v8  ;;  %v1099_v33 = vadd.f32 %v1310_v15, %v1079_v9  ;;  %v1100_v22 = vadd.f32 %v1310_v15, %v1080_v26  ;;  %v1101_v16 = vadd.f32 %v1310_v15, %v1081_v13 }
 0x1ed   : > { %v1086_v6 = vmul.f32 %v1076_v7, %v1797_v25  ;;  %v1102_v24 = vadd.f32 %v1310_v15, %v1082_v29  ;;  %v1087_v10 = vmul.f32 %v1076_v7, %v1801_v34  ;;  %v1103_v20 = vadd.f32 %v1310_v15, %v1083_v31 }
 0x1ee   : > { %1114 = vst [vmem:[%s1912_s6] sm:$0xff] %v1098_v23  ;;  %v1088_v27 = vmul.f32 %v1076_v7, %v1805_v37  ;;  %v1104_v28 = vadd.f32 %v1310_v15, %v1084_v32  ;;  %v1089_v18 = vmul.f32 %v1076_v7, %v1809_v51  ;;  %v1105_v25 = vadd.f32 %v1310_v15, %v1085_v39 }
 0x1ef   : > { %1115 = vst [vmem:[%s1912_s6 + $0x8] sm:$0xff] %v1099_v33  ;;  %v1090_v34 = vmul.f32 %v1076_v7, %v1813_v54  ;;  %v1106_v36 = vadd.f32 %v1310_v15, %v1086_v6  ;;  %v1091_v37 = vmul.f32 %v1076_v7, %v1817_v21  ;;  %v1107_v49 = vadd.f32 %v1310_v15, %v1087_v10 }
 0x1f0   : > { %1116 = vst [vmem:[%s1912_s6 + $0x10] sm:$0xff] %v1100_v22  ;;  %v1092_v50 = vmul.f32 %v1076_v7, %v1821_v0  ;;  %v1108_v51 = vadd.f32 %v1310_v15, %v1088_v27  ;;  %v1093_v52 = vmul.f32 %v1076_v7, %v1825_v2  ;;  %v1109_v53 = vadd.f32 %v1310_v15, %v1089_v18 }
 0x1f1   : > { %1117 = vst [vmem:[%s1912_s6 + $0x18] sm:$0xff] %v1101_v16  ;;  %v1110_v54 = vadd.f32 %v1310_v15, %v1090_v34  ;;  %v1111_v55 = vadd.f32 %v1310_v15, %v1091_v37 }
 0x1f2   : > { %1118 = vst [vmem:[%s1912_s6 + $0x20] sm:$0xff] %v1102_v24  ;;  %v1112_v40 = vadd.f32 %v1310_v15, %v1092_v50  ;;  %v1113_v21 = vadd.f32 %v1310_v15, %v1093_v52 }
 0x1f3   : > { %1119 = vst [vmem:[%s1912_s6 + $0x28] sm:$0xff] %v1103_v20 }
 0x1f4   : > { %1120 = vst [vmem:[%s1912_s6 + $0x30] sm:$0xff] %v1104_v28 }
 0x1f5   : > { %1121 = vst [vmem:[%s1912_s6 + $0x38] sm:$0xff] %v1105_v25 }
 0x1f6   : > { %1122 = vst [vmem:[%s1912_s6 + $0x40] sm:$0xff] %v1106_v36 }
 0x1f7   : > { %1123 = vst [vmem:[%s1912_s6 + $0x48] sm:$0xff] %v1107_v49 }
 0x1f8   : > { %1124 = vst [vmem:[%s1912_s6 + $0x50] sm:$0xff] %v1108_v51 }
 0x1f9   : > { %1125 = vst [vmem:[%s1912_s6 + $0x58] sm:$0xff] %v1109_v53 }
 0x1fa   : > { %1126 = vst [vmem:[%s1912_s6 + $0x60] sm:$0xff] %v1110_v54 }
 0x1fb   : > { %1127 = vst [vmem:[%s1912_s6 + $0x68] sm:$0xff] %v1111_v55 }
 0x1fc   : > { %1128 = vst [vmem:[%s1912_s6 + $0x70] sm:$0xff] %v1112_v40 }
 0x1fd   : > { %1129 = vst [vmem:[%s1912_s6 + $0x78] sm:$0xff] %v1113_v21 }
 0x1fe PF: > { %s16_s21 = sadd.s32 1, %s1321_s21  }
 0x1ff   : > { %p13_p6 = scmp.ge.s32.totalorder %s16_s21, 4  }
 0x201   :  { %15 = sbr.rel (!%p13_p6) target bundleno = 1 (0x1), region = 84 }

</bundles_post_ra>
